<compile_context>
chip_gen: v7x
topology: tpu7x:2x2x1
jax: 0.10.0
libtpu: 0.0.40
codegen_flags: <defaults>
</compile_context>

<pallas_src>
import jax
import jax.numpy as jnp
from jax import lax
from jax.experimental import pallas as pl
from jax.experimental.pallas import tpu as pltpu

_LANE = 128
_UNROLL = 8     # inner-recurrence unroll factor (full unroll inflates live ranges)


def _round_up(x, m):
    return ((x + m - 1) // m) * m


def _vmem_limit_bytes():
    """Scoped-VMEM request derived from the actual chip (v5e/v6e: 128 MiB,
    v7x: 64 MiB).  Falls back to a v7x-safe value if the query is unavailable."""
    try:
        cap = int(pltpu.get_tpu_info().vmem_capacity_bytes)
    except Exception:
        cap = 64 * 1024 * 1024
    return max(32 * 1024 * 1024, min(cap * 3 // 4, 96 * 1024 * 1024))


def _buffered_spec(shape, index_map):
    """Single-buffered BlockSpec for loop-invariant operands (constant index_map).

    Halves the VMEM footprint of resident weights (biggest win on v7x).  Falls
    back to a plain BlockSpec on jax versions without pipeline_mode/Buffered.
    """
    try:
        return pl.BlockSpec(shape, index_map, pipeline_mode=pl.Buffered(1))
    except Exception:
        return pl.BlockSpec(shape, index_map)


def _pad_gate_cols(w, H, HP):
    """Pad gate-ordered [i, f, g, o] columns (..., 4*H) -> (..., 4*HP) with zeros."""
    lead = w.shape[:-1]
    w4 = w.reshape(lead + (4, H))
    pad = [(0, 0)] * (len(lead) + 1) + [(0, HP - H)]
    return jnp.pad(w4, pad).reshape(lead + (4 * HP,))


# ---------------------------------------------------------------------------
# Parallel row-tiled matmul + bias kernel (fc / output projection)
# ---------------------------------------------------------------------------
def _matmul_bias_kernel(x_ref, w_ref, b_ref, o_ref):
    o_ref[...] = (
        jnp.dot(x_ref[...], w_ref[...], preferred_element_type=jnp.float32)
        + b_ref[...].astype(jnp.float32)
    ).astype(o_ref.dtype)


def _select_matmul_tiles(R, K, N, budget):
    def fits(tm, tn):
        # Conservative: assume everything double-buffered.
        return 4 * (2 * tm * K + 2 * (K * tn + tn) + 2 * tm * tn) <= budget

    tn_cands = [t for t in (N, 1024, 512, 256, 128) if t <= N and N % t == 0]
    tm_cands = (8192, 4096, 2048, 1024, 512, 256, 128, 64, 32, 16, 8)
    for tn in tn_cands:
        for tm in tm_cands:          # prefer row tiles that divide R: no pad copy
            if tm <= R and R % tm == 0 and fits(tm, tn):
                return tm, tn
        for tm in tm_cands:          # fall back to a padded ragged last tile
            if fits(tm, tn):
                return min(tm, _round_up(R, 8)), tn
    return 8, min(128, N)


def _matmul_bias(x, w, b, *, vmem_limit):
    """x: (R, K) @ w: (K, N) + b: (1, N) -> (R, N) float32.  N % 128 == 0."""
    R, K = x.shape
    _, N = w.shape
    tm, tn = _select_matmul_tiles(R, K, N, int(vmem_limit * 0.7))
    RP = _round_up(R, tm)
    if RP != R:
        # TODO(synk): handle the ragged last row tile with a masked store instead
        # of this padding copy of the activations.
        x = jnp.pad(x, ((0, RP - R), (0, 0)))

    if tn == N:
        # Full-width weight + constant index map: fetched from HBM exactly once
        # and single-buffered (no re-streaming per row tile).
        w_spec = _buffered_spec((K, tn), lambda i, j: (0, j))
        b_spec = _buffered_spec((1, tn), lambda i, j: (0, j))
    else:
        w_spec = pl.BlockSpec((K, tn), lambda i, j: (0, j))
        b_spec = pl.BlockSpec((1, tn), lambda i, j: (0, j))

    out = pl.pallas_call(
        _matmul_bias_kernel,
        out_shape=jax.ShapeDtypeStruct((RP, N), jnp.float32),
        grid=(RP // tm, N // tn),   # i outer, j inner: x block is cached across j
        in_specs=[pl.BlockSpec((tm, K), lambda i, j: (i, 0)), w_spec, b_spec],
        out_specs=pl.BlockSpec((tm, tn), lambda i, j: (i, j)),
        compiler_params=pltpu.CompilerParams(
            dimension_semantics=("parallel", "parallel"),
            vmem_limit_bytes=vmem_limit,
        ),
    )(x, w, b)
    return out[:R] if RP != R else out


# ---------------------------------------------------------------------------
# Fused input-projection + sequential LSTM recurrence kernel (time-chunked)
# ---------------------------------------------------------------------------
def _lstm_recurrence_kernel(x_ref, w_ih_ref, b_ref, w_hh_ref, h_out_ref, h_sc, c_sc):
    """One grid step == TC LSTM time steps for one batch tile.

    x_ref:     (TC, Bt, E)   embedded tokens for this time chunk (time-major)
    w_ih_ref:  (E, 4*HP)     input->hidden weights   (loop-invariant)
    b_ref:     (1, 4*HP)     b_ih + b_hh, gate-padded (loop-invariant)
    w_hh_ref:  (HP, 4*HP)    hidden->hidden weights  (loop-invariant)
    h_out_ref: (TC, Bt, HP)  hidden states for this chunk
    h_sc,c_sc: (Bt, HP)      recurrent state, persists across time chunks
    """
    @pl.when(pl.program_id(1) == 0)
    def _():
        h_sc[...] = jnp.zeros_like(h_sc)
        c_sc[...] = jnp.zeros_like(c_sc)

    TC, Bt, _ = x_ref.shape
    HP = h_sc.shape[1]
    G = 4 * HP
    mm_dtype = w_hh_ref.dtype
    # Hoisted: JAX does not CSE broadcast_in_dim, so broadcast the bias once.
    bias = jnp.broadcast_to(b_ref[...].astype(jnp.float32), (Bt, G))

    def step(t, carry):
        h, c = carry
        # Input projection fused here (independent of h -> overlaps with the
        # recurrent chain); only h @ W_hh sits on the serial critical path.
        gates = (
            jnp.dot(x_ref[t], w_ih_ref[...], preferred_element_type=jnp.float32)
            + bias
            + jnp.dot(h.astype(mm_dtype), w_hh_ref[...],
                      preferred_element_type=jnp.float32)
        )
        # PyTorch LSTM gate order: i, f, g, o  (HP multiple of 128 -> lane-aligned)
        i_g = jax.nn.sigmoid(gates[:, 0 * HP:1 * HP])
        f_g = jax.nn.sigmoid(gates[:, 1 * HP:2 * HP])
        g_g = jnp.tanh(gates[:, 2 * HP:3 * HP])
        o_g = jax.nn.sigmoid(gates[:, 3 * HP:4 * HP])
        c_new = f_g * c + i_g * g_g
        h_new = o_g * jnp.tanh(c_new)
        h_out_ref[t] = h_new.astype(h_out_ref.dtype)
        return h_new, c_new

    h_fin, c_fin = lax.fori_loop(0, TC, step, (h_sc[...], c_sc[...]),
                                 unroll=min(_UNROLL, TC))
    h_sc[...] = h_fin
    c_sc[...] = c_fin


def _select_time_chunk(T, Bt, E, HP, budget):
    G = 4 * HP
    # Resident weights (counted double-buffered so the budget also holds if
    # Buffered(1) is unavailable) + state scratch + gate/activation temporaries.
    fixed = 4 * (2 * (E * G + HP * G + G) + 2 * Bt * HP) + 4 * (6 * Bt * G)
    for tc in (64, 32, 16, 8):
        stream = 4 * 2 * tc * Bt * (E + HP)      # double-buffered x in + h out
        if fixed + stream <= budget:
            return tc
    return 8


def _lstm_recurrence(x, w_ih, b, w_hh, *, HP, time_chunk, batch_tile, out_dtype,
                     vmem_limit):
    """x: (TP, B, E) time-major embeddings -> h: (TP, B, HP)."""
    TP, B, E = x.shape
    G = 4 * HP
    TC, Bt = time_chunk, batch_tile
    assert TP % TC == 0 and B % Bt == 0
    assert Bt == B or Bt % 8 == 0, "batch tile must be the full batch or a multiple of 8"

    return pl.pallas_call(
        _lstm_recurrence_kernel,
        out_shape=jax.ShapeDtypeStruct((TP, B, HP), out_dtype),
        grid=(B // Bt, TP // TC),
        in_specs=[
            pl.BlockSpec((TC, Bt, E), lambda bb, cc: (cc, bb, 0)),
            _buffered_spec((E, G), lambda bb, cc: (0, 0)),    # W_ih  (invariant)
            _buffered_spec((1, G), lambda bb, cc: (0, 0)),    # bias  (invariant)
            _buffered_spec((HP, G), lambda bb, cc: (0, 0)),   # W_hh  (invariant)
        ],
        out_specs=pl.BlockSpec((TC, Bt, HP), lambda bb, cc: (cc, bb, 0)),
        scratch_shapes=[
            pltpu.VMEM((Bt, HP), jnp.float32),   # h state
            pltpu.VMEM((Bt, HP), jnp.float32),   # c state
        ],
        compiler_params=pltpu.CompilerParams(
            dimension_semantics=("parallel", "arbitrary"),
            vmem_limit_bytes=vmem_limit,
        ),
    )(x, w_ih, b, w_hh)


# ---------------------------------------------------------------------------
# Full forward pass (Embedding -> LSTM -> Linear), batch_first like PyTorch
# ---------------------------------------------------------------------------
def _pick_batch_tile(B, batch_tile):
    if batch_tile is not None:
        return batch_tile
    # Megacore: two "parallel" batch tiles let dual-TensorCore chips (v7x)
    # shard the recurrence; also halves per-core streamed-block VMEM.
    if B >= 16 and B % 2 == 0 and (B // 2) % 8 == 0:
        return B // 2
    return B


def lstm_polymer_forward(tokens, params, *, time_chunk=None, batch_tile=None,
                         matmul_dtype=jnp.float32):
    """tokens: int32 (B, T).  Returns logits (B, T, V) like the PyTorch module.

    matmul_dtype=jnp.bfloat16 switches MXU operands (weights, embeddings,
    recurrent h) to bf16 with f32 accumulation: faster on v5e/v6e/v7x MXUs and
    half the DMA bytes, but no longer matches the f32 reference at 1e-4, so it
    is OFF by default (flagged per the review).
    """
    B, T = tokens.shape
    E = params["embedding"].shape[1]
    H = params["w_hh_t"].shape[0]
    V = params["w_fc_t"].shape[1]
    HP = _round_up(H, _LANE)
    VP = _round_up(V, 2 * _LANE)     # >=256-wide fc tiles (v6e/v7x MXU pass width)
    vmem_limit = _vmem_limit_bytes()

    # Parameter packing (lane-aligned gate columns; zero padding is exact:
    # padded hidden units stay 0 and padded logit columns are sliced away).
    w_ih = _pad_gate_cols(params["w_ih_t"], H, HP).astype(matmul_dtype)        # (E, 4HP)
    w_hh = _pad_gate_cols(
        jnp.pad(params["w_hh_t"], ((0, HP - H), (0, 0))), H, HP
    ).astype(matmul_dtype)                                                      # (HP, 4HP)
    b_g = _pad_gate_cols((params["b_ih"] + params["b_hh"])[None, :], H, HP)     # (1, 4HP)
    w_fc = jnp.pad(params["w_fc_t"], ((0, HP - H), (0, VP - V))).astype(matmul_dtype)
    b_fc = jnp.pad(params["b_fc"], (0, VP - V))[None, :]                        # (1, VP)

    # Embedding gather straight into the time-major layout (no activation
    # transpose on the input side).  Data-dependent gather stays in XLA.
    x = jnp.take(params["embedding"], tokens.T, axis=0).astype(matmul_dtype)    # (T, B, E)

    Bt = _pick_batch_tile(B, batch_tile)
    TC = time_chunk or _select_time_chunk(T, Bt, E, HP, int(vmem_limit * 0.7))
    TC = min(TC, max(8, _round_up(T, 8)))
    TP = _round_up(T, TC)
    if TP != T:
        x = jnp.pad(x, ((0, TP - T), (0, 0), (0, 0)))

    # Fused input-projection + LSTM recurrence (sequential, time-chunked).
    h = _lstm_recurrence(x, w_ih, b_g, w_hh, HP=HP, time_chunk=TC, batch_tile=Bt,
                         out_dtype=matmul_dtype, vmem_limit=vmem_limit)         # (TP, B, HP)

    # Output projection; apply the (T,B)<->(B,T) layout swap to the smaller tensor.
    # TODO(synk): fuse the layout swap into the fc kernel's output BlockSpec
    # (needs a batch-major h layout from the recurrence).
    if VP > HP:
        h_bm = jnp.transpose(h, (1, 0, 2)).reshape(B * TP, HP)
        logits = _matmul_bias(h_bm, w_fc, b_fc, vmem_limit=vmem_limit)
        return logits.reshape(B, TP, VP)[:, :T, :V]
    logits = _matmul_bias(h.reshape(TP * B, HP), w_fc, b_fc, vmem_limit=vmem_limit)
    logits = logits.reshape(TP, B, VP)[:T, :, :V]
    return jnp.transpose(logits, (1, 0, 2))


# ---------------------------------------------------------------------------
# Pure-JAX reference mirroring torch Embedding -> LSTM(batch_first) -> Linear
# ---------------------------------------------------------------------------
def reference_forward(tokens, params):
    emb = jnp.take(params["embedding"], tokens, axis=0)     # (B, T, E)
    B, T, E = emb.shape
    H = params["w_hh_t"].shape[0]
    b = (params["b_ih"] + params["b_hh"])[None, :]

    def step(carry, x_t):
        h, c = carry
        gates = x_t @ params["w_ih_t"] + h @ params["w_hh_t"] + b
        i_g = jax.nn.sigmoid(gates[:, 0 * H:1 * H])
        f_g = jax.nn.sigmoid(gates[:, 1 * H:2 * H])
        g_g = jnp.tanh(gates[:, 2 * H:3 * H])
        o_g = jax.nn.sigmoid(gates[:, 3 * H:4 * H])
        c = f_g * c + i_g * g_g
        h = o_g * jnp.tanh(c)
        return (h, c), h

    h0 = jnp.zeros((B, H), jnp.float32)
    c0 = jnp.zeros((B, H), jnp.float32)
    _, hs = lax.scan(step, (h0, c0), jnp.transpose(emb, (1, 0, 2)))  # (T, B, H)
    out = hs @ params["w_fc_t"] + params["b_fc"][None, None, :]      # (T, B, V)
    return jnp.transpose(out, (1, 0, 2))


def init_params(key, vocab_size, embedding_dim, hidden_dim):
    ks = jax.random.split(key, 7)
    s = 0.1
    return {
        "embedding": s * jax.random.normal(ks[0], (vocab_size, embedding_dim),
                                           jnp.float32),
        # stored pre-transposed relative to PyTorch's (4H, E) / (4H, H) / (V, H)
        "w_ih_t": s * jax.random.normal(ks[1], (embedding_dim, 4 * hidden_dim),
                                        jnp.float32),
        "w_hh_t": s * jax.random.normal(ks[2], (hidden_dim, 4 * hidden_dim),
                                        jnp.float32),
        "b_ih": s * jax.random.normal(ks[3], (4 * hidden_dim,), jnp.float32),
        "b_hh": s * jax.random.normal(ks[4], (4 * hidden_dim,), jnp.float32),
        "w_fc_t": s * jax.random.normal(ks[5], (hidden_dim, vocab_size),
                                        jnp.float32),
        "b_fc": s * jax.random.normal(ks[6], (vocab_size,), jnp.float32),
    }


if __name__ == "__main__":
    VOCAB, EMB, HID = 16, 32, 32
    B, T = 2, 8

    key = jax.random.PRNGKey(0)
    k_tok, k_par = jax.random.split(key)
    tokens = jax.random.randint(k_tok, (B, T), 0, VOCAB, dtype=jnp.int32)
    params = init_params(k_par, VOCAB, EMB, HID)

    fwd = jax.jit(lstm_polymer_forward)
    out = jax.block_until_ready(fwd(tokens, params))

    ref = reference_forward(tokens, params)
    assert out.shape == (B, T, VOCAB), out.shape
    max_err = float(jnp.max(jnp.abs(out - ref)))
    assert jnp.allclose(out, ref, atol=1e-4, rtol=1e-4), max_err

    print("KERNEL_OK")
</pallas_src>

<mosaic_0001>
module attributes {stable_mosaic.version = 11 : i64} {
  func.func @_matmul_bias_kernel(%arg0: i32, %arg1: i32, %arg2: memref<16x128xf32, #tpu.memory_space<vmem>>, %arg3: memref<128x256xf32, #tpu.memory_space<vmem>>, %arg4: memref<1x256xf32, #tpu.memory_space<vmem>>, %arg5: memref<16x256xf32, #tpu.memory_space<vmem>>) attributes {dimension_semantics = [#tpu.dimension_semantics<parallel>, #tpu.dimension_semantics<parallel>], iteration_bounds = array<i64: 1, 1>, scalar_prefetch = 0 : i64, scratch_operands = 0 : i64, tpu.core_type = #tpu.core_type<tc>, window_params = [{transform_indices = @transform_0, window_bounds = array<i64: 16, 128>}, {pipeline_mode = #tpu.pipeline_mode<synchronous>, transform_indices = @transform_1, window_bounds = array<i64: 128, 256>}, {pipeline_mode = #tpu.pipeline_mode<synchronous>, transform_indices = @transform_2, window_bounds = array<i64: 1, 256>}, {transform_indices = @transform_3, window_bounds = array<i64: 16, 256>}]} {
    %c0 = arith.constant 0 : index
    %c0_0 = arith.constant 0 : index
    %0 = vector.load %arg2[%c0, %c0_0] : memref<16x128xf32, #tpu.memory_space<vmem>>, vector<16x128xf32>
    %c0_1 = arith.constant 0 : index
    %c0_2 = arith.constant 0 : index
    %1 = vector.load %arg3[%c0_1, %c0_2] : memref<128x256xf32, #tpu.memory_space<vmem>>, vector<128x256xf32>
    %cst = arith.constant dense<0.000000e+00> : vector<16x256xf32>
    %2 = tpu.matmul %0, %1, %cst {dimension_numbers = #tpu.dot_dimension_numbers<[1], [0], [0], [1], [0, 0, 1, 1], [], []>} : vector<16x128xf32>, vector<128x256xf32>, vector<16x256xf32> -> vector<16x256xf32>
    %c0_3 = arith.constant 0 : index
    %c0_4 = arith.constant 0 : index
    %3 = vector.load %arg4[%c0_3, %c0_4] : memref<1x256xf32, #tpu.memory_space<vmem>>, vector<1x256xf32>
    %4 = vector.broadcast %3 : vector<1x256xf32> to vector<16x256xf32>
    %5 = arith.addf %2, %4 : vector<16x256xf32>
    %c0_5 = arith.constant 0 : index
    %c0_6 = arith.constant 0 : index
    %6 = vector.load %arg5[%c0_5, %c0_6] : memref<16x256xf32, #tpu.memory_space<vmem>>, vector<16x256xf32>
    tpu.vector_store %arg5[%c0_5, %c0_6], %5 {strides = array<i32>} : memref<16x256xf32, #tpu.memory_space<vmem>>, vector<16x256xf32>,
    return
  }
  func.func @transform_0(%arg0: i32, %arg1: i32) -> (i32, i32) {
    %c0_i32 = arith.constant 0 : i32
    %c0_i32_0 = arith.constant 0 : i32
    return %arg0, %c0_i32 : i32, i32
  }
  func.func @transform_1(%arg0: i32, %arg1: i32) -> (i32, i32) {
    %c0_i32 = arith.constant 0 : i32
    %c0_i32_0 = arith.constant 0 : i32
    return %c0_i32, %arg1 : i32, i32
  }
  func.func @transform_2(%arg0: i32, %arg1: i32) -> (i32, i32) {
    %c0_i32 = arith.constant 0 : i32
    %c0_i32_0 = arith.constant 0 : i32
    return %c0_i32, %arg1 : i32, i32
  }
  func.func @transform_3(%arg0: i32, %arg1: i32) -> (i32, i32) {
    %c0_i32 = arith.constant 0 : i32
    return %arg0, %arg1 : i32, i32
  }
}

module attributes {stable_mosaic.version = 11 : i64} {
  func.func @_lstm_recurrence_kernel(%arg0: i32, %arg1: i32, %arg2: memref<8x2x32xf32, #tpu.memory_space<vmem>>, %arg3: memref<32x512xf32, #tpu.memory_space<vmem>>, %arg4: memref<1x512xf32, #tpu.memory_space<vmem>>, %arg5: memref<128x512xf32, #tpu.memory_space<vmem>>, %arg6: memref<8x2x128xf32, #tpu.memory_space<vmem>>, %arg7: memref<2x128xf32, #tpu.memory_space<vmem>>, %arg8: memref<2x128xf32, #tpu.memory_space<vmem>>) attributes {dimension_semantics = [#tpu.dimension_semantics<parallel>, #tpu.dimension_semantics<arbitrary>], iteration_bounds = array<i64: 1, 1>, scalar_prefetch = 0 : i64, scratch_operands = 2 : i64, tpu.core_type = #tpu.core_type<tc>, window_params = [{transform_indices = @transform_0, window_bounds = array<i64: 8, 2, 32>}, {pipeline_mode = #tpu.pipeline_mode<synchronous>, transform_indices = @transform_1, window_bounds = array<i64: 32, 512>}, {pipeline_mode = #tpu.pipeline_mode<synchronous>, transform_indices = @transform_2, window_bounds = array<i64: 1, 512>}, {pipeline_mode = #tpu.pipeline_mode<synchronous>, transform_indices = @transform_3, window_bounds = array<i64: 128, 512>}, {transform_indices = @transform_4, window_bounds = array<i64: 8, 2, 128>}]} {
    %c0_i32 = arith.constant 0 : i32
    %0 = arith.cmpi eq, %arg1, %c0_i32 : i32
    %1 = arith.extui %0 : i1 to i32
    %c0_i32_0 = arith.constant 0 : i32
    %2 = arith.cmpi ne, %1, %c0_i32_0 : i32
    scf.if %2 {
      %cst_114 = arith.constant 0.000000e+00 : f32
      %314 = vector.broadcast %cst_114 : f32 to vector<2x128xf32>
      %c0_115 = arith.constant 0 : index
      %c0_116 = arith.constant 0 : index
      %315 = vector.load %arg7[%c0_115, %c0_116] : memref<2x128xf32, #tpu.memory_space<vmem>>, vector<2x128xf32>
      tpu.vector_store %arg7[%c0_115, %c0_116], %314 {strides = array<i32>} : memref<2x128xf32, #tpu.memory_space<vmem>>, vector<2x128xf32>,
      %cst_117 = arith.constant 0.000000e+00 : f32
      %316 = vector.broadcast %cst_117 : f32 to vector<2x128xf32>
      %c0_118 = arith.constant 0 : index
      %c0_119 = arith.constant 0 : index
      %317 = vector.load %arg8[%c0_118, %c0_119] : memref<2x128xf32, #tpu.memory_space<vmem>>, vector<2x128xf32>
      tpu.vector_store %arg8[%c0_118, %c0_119], %316 {strides = array<i32>} : memref<2x128xf32, #tpu.memory_space<vmem>>, vector<2x128xf32>,
    } else {
    }
    %c0 = arith.constant 0 : index
    %c0_1 = arith.constant 0 : index
    %3 = vector.load %arg4[%c0, %c0_1] : memref<1x512xf32, #tpu.memory_space<vmem>>, vector<1x512xf32>
    %4 = vector.shape_cast %3 : vector<1x512xf32> to vector<1x512xf32>
    %5 = vector.broadcast %4 : vector<1x512xf32> to vector<2x512xf32>
    %c0_2 = arith.constant 0 : index
    %c0_3 = arith.constant 0 : index
    %6 = vector.load %arg7[%c0_2, %c0_3] : memref<2x128xf32, #tpu.memory_space<vmem>>, vector<2x128xf32>
    %c0_4 = arith.constant 0 : index
    %c0_5 = arith.constant 0 : index
    %7 = vector.load %arg8[%c0_4, %c0_5] : memref<2x128xf32, #tpu.memory_space<vmem>>, vector<2x128xf32>
    %c0_i32_6 = arith.constant 0 : i32
    %8 = arith.index_cast %c0_i32_6 : i32 to index
    %c0_7 = arith.constant 0 : index
    %c0_8 = arith.constant 0 : index
    %9 = vector.load %arg2[%8, %c0_7, %c0_8] : memref<8x2x32xf32, #tpu.memory_space<vmem>>, vector<1x2x32xf32>
    %10 = vector.shape_cast %9 : vector<1x2x32xf32> to vector<2x32xf32>
    %c0_9 = arith.constant 0 : index
    %c0_10 = arith.constant 0 : index
    %11 = vector.load %arg3[%c0_9, %c0_10] : memref<32x512xf32, #tpu.memory_space<vmem>>, vector<32x512xf32>
    %cst = arith.constant dense<0.000000e+00> : vector<2x512xf32>
    %12 = tpu.matmul %10, %11, %cst {dimension_numbers = #tpu.dot_dimension_numbers<[1], [0], [0], [1], [0, 0, 1, 1], [], []>} : vector<2x32xf32>, vector<32x512xf32>, vector<2x512xf32> -> vector<2x512xf32>
    %13 = arith.addf %12, %5 : vector<2x512xf32>
    %c0_11 = arith.constant 0 : index
    %c0_12 = arith.constant 0 : index
    %14 = vector.load %arg5[%c0_11, %c0_12] : memref<128x512xf32, #tpu.memory_space<vmem>>, vector<128x512xf32>
    %cst_13 = arith.constant dense<0.000000e+00> : vector<2x512xf32>
    %15 = tpu.matmul %6, %14, %cst_13 {dimension_numbers = #tpu.dot_dimension_numbers<[1], [0], [0], [1], [0, 0, 1, 1], [], []>} : vector<2x128xf32>, vector<128x512xf32>, vector<2x512xf32> -> vector<2x512xf32>
    %16 = arith.addf %13, %15 : vector<2x512xf32>
    %17 = vector.extract_strided_slice %16 {offsets = [0, 0], sizes = [2, 128], strides = [1, 1]} : vector<2x512xf32> to vector<2x128xf32>
    %18 = arith.negf %17 : vector<2x128xf32>
    %19 = math.exp %18 : vector<2x128xf32>
    %cst_14 = arith.constant 1.000000e+00 : f32
    %20 = vector.broadcast %cst_14 : f32 to vector<2x128xf32>
    %21 = arith.addf %20, %19 : vector<2x128xf32>
    %22 = arith.divf %20, %21 : vector<2x128xf32>
    %23 = vector.extract_strided_slice %16 {offsets = [0, 128], sizes = [2, 128], strides = [1, 1]} : vector<2x512xf32> to vector<2x128xf32>
    %24 = arith.negf %23 : vector<2x128xf32>
    %25 = math.exp %24 : vector<2x128xf32>
    %cst_15 = arith.constant 1.000000e+00 : f32
    %26 = vector.broadcast %cst_15 : f32 to vector<2x128xf32>
    %27 = arith.addf %26, %25 : vector<2x128xf32>
    %28 = arith.divf %26, %27 : vector<2x128xf32>
    %29 = vector.extract_strided_slice %16 {offsets = [0, 256], sizes = [2, 128], strides = [1, 1]} : vector<2x512xf32> to vector<2x128xf32>
    %30 = math.tanh %29 : vector<2x128xf32>
    %31 = vector.extract_strided_slice %16 {offsets = [0, 384], sizes = [2, 128], strides = [1, 1]} : vector<2x512xf32> to vector<2x128xf32>
    %32 = arith.negf %31 : vector<2x128xf32>
    %33 = math.exp %32 : vector<2x128xf32>
    %cst_16 = arith.constant 1.000000e+00 : f32
    %34 = vector.broadcast %cst_16 : f32 to vector<2x128xf32>
    %35 = arith.addf %34, %33 : vector<2x128xf32>
    %36 = arith.divf %34, %35 : vector<2x128xf32>
    %37 = arith.mulf %28, %7 : vector<2x128xf32>
    %38 = arith.mulf %22, %30 : vector<2x128xf32>
    %39 = arith.addf %37, %38 : vector<2x128xf32>
    %40 = math.tanh %39 : vector<2x128xf32>
    %41 = arith.mulf %36, %40 : vector<2x128xf32>
    %42 = arith.index_cast %c0_i32_6 : i32 to index
    %c0_17 = arith.constant 0 : index
    %c0_18 = arith.constant 0 : index
    %43 = vector.load %arg6[%42, %c0_17, %c0_18] : memref<8x2x128xf32, #tpu.memory_space<vmem>>, vector<1x2x128xf32>
    %44 = vector.shape_cast %43 : vector<1x2x128xf32> to vector<2x128xf32>
    %45 = vector.shape_cast %41 : vector<2x128xf32> to vector<1x2x128xf32>
    tpu.vector_store %arg6[%42, %c0_17, %c0_18], %45 {strides = array<i32>} : memref<8x2x128xf32, #tpu.memory_space<vmem>>, vector<1x2x128xf32>,
    %c1_i32 = arith.constant 1 : i32
    %46 = arith.index_cast %c1_i32 : i32 to index
    %c0_19 = arith.constant 0 : index
    %c0_20 = arith.constant 0 : index
    %47 = vector.load %arg2[%46, %c0_19, %c0_20] : memref<8x2x32xf32, #tpu.memory_space<vmem>>, vector<1x2x32xf32>
    %48 = vector.shape_cast %47 : vector<1x2x32xf32> to vector<2x32xf32>
    %c0_21 = arith.constant 0 : index
    %c0_22 = arith.constant 0 : index
    %49 = vector.load %arg3[%c0_21, %c0_22] : memref<32x512xf32, #tpu.memory_space<vmem>>, vector<32x512xf32>
    %cst_23 = arith.constant dense<0.000000e+00> : vector<2x512xf32>
    %50 = tpu.matmul %48, %49, %cst_23 {dimension_numbers = #tpu.dot_dimension_numbers<[1], [0], [0], [1], [0, 0, 1, 1], [], []>} : vector<2x32xf32>, vector<32x512xf32>, vector<2x512xf32> -> vector<2x512xf32>
    %51 = arith.addf %50, %5 : vector<2x512xf32>
    %c0_24 = arith.constant 0 : index
    %c0_25 = arith.constant 0 : index
    %52 = vector.load %arg5[%c0_24, %c0_25] : memref<128x512xf32, #tpu.memory_space<vmem>>, vector<128x512xf32>
    %cst_26 = arith.constant dense<0.000000e+00> : vector<2x512xf32>
    %53 = tpu.matmul %41, %52, %cst_26 {dimension_numbers = #tpu.dot_dimension_numbers<[1], [0], [0], [1], [0, 0, 1, 1], [], []>} : vector<2x128xf32>, vector<128x512xf32>, vector<2x512xf32> -> vector<2x512xf32>
    %54 = arith.addf %51, %53 : vector<2x512xf32>
    %55 = vector.extract_strided_slice %54 {offsets = [0, 0], sizes = [2, 128], strides = [1, 1]} : vector<2x512xf32> to vector<2x128xf32>
    %56 = arith.negf %55 : vector<2x128xf32>
    %57 = math.exp %56 : vector<2x128xf32>
    %cst_27 = arith.constant 1.000000e+00 : f32
    %58 = vector.broadcast %cst_27 : f32 to vector<2x128xf32>
    %59 = arith.addf %58, %57 : vector<2x128xf32>
    %60 = arith.divf %58, %59 : vector<2x128xf32>
    %61 = vector.extract_strided_slice %54 {offsets = [0, 128], sizes = [2, 128], strides = [1, 1]} : vector<2x512xf32> to vector<2x128xf32>
    %62 = arith.negf %61 : vector<2x128xf32>
    %63 = math.exp %62 : vector<2x128xf32>
    %cst_28 = arith.constant 1.000000e+00 : f32
    %64 = vector.broadcast %cst_28 : f32 to vector<2x128xf32>
    %65 = arith.addf %64, %63 : vector<2x128xf32>
    %66 = arith.divf %64, %65 : vector<2x128xf32>
    %67 = vector.extract_strided_slice %54 {offsets = [0, 256], sizes = [2, 128], strides = [1, 1]} : vector<2x512xf32> to vector<2x128xf32>
    %68 = math.tanh %67 : vector<2x128xf32>
    %69 = vector.extract_strided_slice %54 {offsets = [0, 384], sizes = [2, 128], strides = [1, 1]} : vector<2x512xf32> to vector<2x128xf32>
    %70 = arith.negf %69 : vector<2x128xf32>
    %71 = math.exp %70 : vector<2x128xf32>
    %cst_29 = arith.constant 1.000000e+00 : f32
    %72 = vector.broadcast %cst_29 : f32 to vector<2x128xf32>
    %73 = arith.addf %72, %71 : vector<2x128xf32>
    %74 = arith.divf %72, %73 : vector<2x128xf32>
    %75 = arith.mulf %66, %39 : vector<2x128xf32>
    %76 = arith.mulf %60, %68 : vector<2x128xf32>
    %77 = arith.addf %75, %76 : vector<2x128xf32>
    %78 = math.tanh %77 : vector<2x128xf32>
    %79 = arith.mulf %74, %78 : vector<2x128xf32>
    %80 = arith.index_cast %c1_i32 : i32 to index
    %c0_30 = arith.constant 0 : index
    %c0_31 = arith.constant 0 : index
    %81 = vector.load %arg6[%80, %c0_30, %c0_31] : memref<8x2x128xf32, #tpu.memory_space<vmem>>, vector<1x2x128xf32>
    %82 = vector.shape_cast %81 : vector<1x2x128xf32> to vector<2x128xf32>
    %83 = vector.shape_cast %79 : vector<2x128xf32> to vector<1x2x128xf32>
    tpu.vector_store %arg6[%80, %c0_30, %c0_31], %83 {strides = array<i32>} : memref<8x2x128xf32, #tpu.memory_space<vmem>>, vector<1x2x128xf32>,
    %c2_i32 = arith.constant 2 : i32
    %84 = arith.index_cast %c2_i32 : i32 to index
    %c0_32 = arith.constant 0 : index
    %c0_33 = arith.constant 0 : index
    %85 = vector.load %arg2[%84, %c0_32, %c0_33] : memref<8x2x32xf32, #tpu.memory_space<vmem>>, vector<1x2x32xf32>
    %86 = vector.shape_cast %85 : vector<1x2x32xf32> to vector<2x32xf32>
    %c0_34 = arith.constant 0 : index
    %c0_35 = arith.constant 0 : index
    %87 = vector.load %arg3[%c0_34, %c0_35] : memref<32x512xf32, #tpu.memory_space<vmem>>, vector<32x512xf32>
    %cst_36 = arith.constant dense<0.000000e+00> : vector<2x512xf32>
    %88 = tpu.matmul %86, %87, %cst_36 {dimension_numbers = #tpu.dot_dimension_numbers<[1], [0], [0], [1], [0, 0, 1, 1], [], []>} : vector<2x32xf32>, vector<32x512xf32>, vector<2x512xf32> -> vector<2x512xf32>
    %89 = arith.addf %88, %5 : vector<2x512xf32>
    %c0_37 = arith.constant 0 : index
    %c0_38 = arith.constant 0 : index
    %90 = vector.load %arg5[%c0_37, %c0_38] : memref<128x512xf32, #tpu.memory_space<vmem>>, vector<128x512xf32>
    %cst_39 = arith.constant dense<0.000000e+00> : vector<2x512xf32>
    %91 = tpu.matmul %79, %90, %cst_39 {dimension_numbers = #tpu.dot_dimension_numbers<[1], [0], [0], [1], [0, 0, 1, 1], [], []>} : vector<2x128xf32>, vector<128x512xf32>, vector<2x512xf32> -> vector<2x512xf32>
    %92 = arith.addf %89, %91 : vector<2x512xf32>
    %93 = vector.extract_strided_slice %92 {offsets = [0, 0], sizes = [2, 128], strides = [1, 1]} : vector<2x512xf32> to vector<2x128xf32>
    %94 = arith.negf %93 : vector<2x128xf32>
    %95 = math.exp %94 : vector<2x128xf32>
    %cst_40 = arith.constant 1.000000e+00 : f32
    %96 = vector.broadcast %cst_40 : f32 to vector<2x128xf32>
    %97 = arith.addf %96, %95 : vector<2x128xf32>
    %98 = arith.divf %96, %97 : vector<2x128xf32>
    %99 = vector.extract_strided_slice %92 {offsets = [0, 128], sizes = [2, 128], strides = [1, 1]} : vector<2x512xf32> to vector<2x128xf32>
    %100 = arith.negf %99 : vector<2x128xf32>
    %101 = math.exp %100 : vector<2x128xf32>
    %cst_41 = arith.constant 1.000000e+00 : f32
    %102 = vector.broadcast %cst_41 : f32 to vector<2x128xf32>
    %103 = arith.addf %102, %101 : vector<2x128xf32>
    %104 = arith.divf %102, %103 : vector<2x128xf32>
    %105 = vector.extract_strided_slice %92 {offsets = [0, 256], sizes = [2, 128], strides = [1, 1]} : vector<2x512xf32> to vector<2x128xf32>
    %106 = math.tanh %105 : vector<2x128xf32>
    %107 = vector.extract_strided_slice %92 {offsets = [0, 384], sizes = [2, 128], strides = [1, 1]} : vector<2x512xf32> to vector<2x128xf32>
    %108 = arith.negf %107 : vector<2x128xf32>
    %109 = math.exp %108 : vector<2x128xf32>
    %cst_42 = arith.constant 1.000000e+00 : f32
    %110 = vector.broadcast %cst_42 : f32 to vector<2x128xf32>
    %111 = arith.addf %110, %109 : vector<2x128xf32>
    %112 = arith.divf %110, %111 : vector<2x128xf32>
    %113 = arith.mulf %104, %77 : vector<2x128xf32>
    %114 = arith.mulf %98, %106 : vector<2x128xf32>
    %115 = arith.addf %113, %114 : vector<2x128xf32>
    %116 = math.tanh %115 : vector<2x128xf32>
    %117 = arith.mulf %112, %116 : vector<2x128xf32>
    %118 = arith.index_cast %c2_i32 : i32 to index
    %c0_43 = arith.constant 0 : index
    %c0_44 = arith.constant 0 : index
    %119 = vector.load %arg6[%118, %c0_43, %c0_44] : memref<8x2x128xf32, #tpu.memory_space<vmem>>, vector<1x2x128xf32>
    %120 = vector.shape_cast %119 : vector<1x2x128xf32> to vector<2x128xf32>
    %121 = vector.shape_cast %117 : vector<2x128xf32> to vector<1x2x128xf32>
    tpu.vector_store %arg6[%118, %c0_43, %c0_44], %121 {strides = array<i32>} : memref<8x2x128xf32, #tpu.memory_space<vmem>>, vector<1x2x128xf32>,
    %c3_i32 = arith.constant 3 : i32
    %122 = arith.index_cast %c3_i32 : i32 to index
    %c0_45 = arith.constant 0 : index
    %c0_46 = arith.constant 0 : index
    %123 = vector.load %arg2[%122, %c0_45, %c0_46] : memref<8x2x32xf32, #tpu.memory_space<vmem>>, vector<1x2x32xf32>
    %124 = vector.shape_cast %123 : vector<1x2x32xf32> to vector<2x32xf32>
    %c0_47 = arith.constant 0 : index
    %c0_48 = arith.constant 0 : index
    %125 = vector.load %arg3[%c0_47, %c0_48] : memref<32x512xf32, #tpu.memory_space<vmem>>, vector<32x512xf32>
    %cst_49 = arith.constant dense<0.000000e+00> : vector<2x512xf32>
    %126 = tpu.matmul %124, %125, %cst_49 {dimension_numbers = #tpu.dot_dimension_numbers<[1], [0], [0], [1], [0, 0, 1, 1], [], []>} : vector<2x32xf32>, vector<32x512xf32>, vector<2x512xf32> -> vector<2x512xf32>
    %127 = arith.addf %126, %5 : vector<2x512xf32>
    %c0_50 = arith.constant 0 : index
    %c0_51 = arith.constant 0 : index
    %128 = vector.load %arg5[%c0_50, %c0_51] : memref<128x512xf32, #tpu.memory_space<vmem>>, vector<128x512xf32>
    %cst_52 = arith.constant dense<0.000000e+00> : vector<2x512xf32>
    %129 = tpu.matmul %117, %128, %cst_52 {dimension_numbers = #tpu.dot_dimension_numbers<[1], [0], [0], [1], [0, 0, 1, 1], [], []>} : vector<2x128xf32>, vector<128x512xf32>, vector<2x512xf32> -> vector<2x512xf32>
    %130 = arith.addf %127, %129 : vector<2x512xf32>
    %131 = vector.extract_strided_slice %130 {offsets = [0, 0], sizes = [2, 128], strides = [1, 1]} : vector<2x512xf32> to vector<2x128xf32>
    %132 = arith.negf %131 : vector<2x128xf32>
    %133 = math.exp %132 : vector<2x128xf32>
    %cst_53 = arith.constant 1.000000e+00 : f32
    %134 = vector.broadcast %cst_53 : f32 to vector<2x128xf32>
    %135 = arith.addf %134, %133 : vector<2x128xf32>
    %136 = arith.divf %134, %135 : vector<2x128xf32>
    %137 = vector.extract_strided_slice %130 {offsets = [0, 128], sizes = [2, 128], strides = [1, 1]} : vector<2x512xf32> to vector<2x128xf32>
    %138 = arith.negf %137 : vector<2x128xf32>
    %139 = math.exp %138 : vector<2x128xf32>
    %cst_54 = arith.constant 1.000000e+00 : f32
    %140 = vector.broadcast %cst_54 : f32 to vector<2x128xf32>
    %141 = arith.addf %140, %139 : vector<2x128xf32>
    %142 = arith.divf %140, %141 : vector<2x128xf32>
    %143 = vector.extract_strided_slice %130 {offsets = [0, 256], sizes = [2, 128], strides = [1, 1]} : vector<2x512xf32> to vector<2x128xf32>
    %144 = math.tanh %143 : vector<2x128xf32>
    %145 = vector.extract_strided_slice %130 {offsets = [0, 384], sizes = [2, 128], strides = [1, 1]} : vector<2x512xf32> to vector<2x128xf32>
    %146 = arith.negf %145 : vector<2x128xf32>
    %147 = math.exp %146 : vector<2x128xf32>
    %cst_55 = arith.constant 1.000000e+00 : f32
    %148 = vector.broadcast %cst_55 : f32 to vector<2x128xf32>
    %149 = arith.addf %148, %147 : vector<2x128xf32>
    %150 = arith.divf %148, %149 : vector<2x128xf32>
    %151 = arith.mulf %142, %115 : vector<2x128xf32>
    %152 = arith.mulf %136, %144 : vector<2x128xf32>
    %153 = arith.addf %151, %152 : vector<2x128xf32>
    %154 = math.tanh %153 : vector<2x128xf32>
    %155 = arith.mulf %150, %154 : vector<2x128xf32>
    %156 = arith.index_cast %c3_i32 : i32 to index
    %c0_56 = arith.constant 0 : index
    %c0_57 = arith.constant 0 : index
    %157 = vector.load %arg6[%156, %c0_56, %c0_57] : memref<8x2x128xf32, #tpu.memory_space<vmem>>, vector<1x2x128xf32>
    %158 = vector.shape_cast %157 : vector<1x2x128xf32> to vector<2x128xf32>
    %159 = vector.shape_cast %155 : vector<2x128xf32> to vector<1x2x128xf32>
    tpu.vector_store %arg6[%156, %c0_56, %c0_57], %159 {strides = array<i32>} : memref<8x2x128xf32, #tpu.memory_space<vmem>>, vector<1x2x128xf32>,
    %c4_i32 = arith.constant 4 : i32
    %160 = arith.index_cast %c4_i32 : i32 to index
    %c0_58 = arith.constant 0 : index
    %c0_59 = arith.constant 0 : index
    %161 = vector.load %arg2[%160, %c0_58, %c0_59] : memref<8x2x32xf32, #tpu.memory_space<vmem>>, vector<1x2x32xf32>
    %162 = vector.shape_cast %161 : vector<1x2x32xf32> to vector<2x32xf32>
    %c0_60 = arith.constant 0 : index
    %c0_61 = arith.constant 0 : index
    %163 = vector.load %arg3[%c0_60, %c0_61] : memref<32x512xf32, #tpu.memory_space<vmem>>, vector<32x512xf32>
    %cst_62 = arith.constant dense<0.000000e+00> : vector<2x512xf32>
    %164 = tpu.matmul %162, %163, %cst_62 {dimension_numbers = #tpu.dot_dimension_numbers<[1], [0], [0], [1], [0, 0, 1, 1], [], []>} : vector<2x32xf32>, vector<32x512xf32>, vector<2x512xf32> -> vector<2x512xf32>
    %165 = arith.addf %164, %5 : vector<2x512xf32>
    %c0_63 = arith.constant 0 : index
    %c0_64 = arith.constant 0 : index
    %166 = vector.load %arg5[%c0_63, %c0_64] : memref<128x512xf32, #tpu.memory_space<vmem>>, vector<128x512xf32>
    %cst_65 = arith.constant dense<0.000000e+00> : vector<2x512xf32>
    %167 = tpu.matmul %155, %166, %cst_65 {dimension_numbers = #tpu.dot_dimension_numbers<[1], [0], [0], [1], [0, 0, 1, 1], [], []>} : vector<2x128xf32>, vector<128x512xf32>, vector<2x512xf32> -> vector<2x512xf32>
    %168 = arith.addf %165, %167 : vector<2x512xf32>
    %169 = vector.extract_strided_slice %168 {offsets = [0, 0], sizes = [2, 128], strides = [1, 1]} : vector<2x512xf32> to vector<2x128xf32>
    %170 = arith.negf %169 : vector<2x128xf32>
    %171 = math.exp %170 : vector<2x128xf32>
    %cst_66 = arith.constant 1.000000e+00 : f32
    %172 = vector.broadcast %cst_66 : f32 to vector<2x128xf32>
    %173 = arith.addf %172, %171 : vector<2x128xf32>
    %174 = arith.divf %172, %173 : vector<2x128xf32>
    %175 = vector.extract_strided_slice %168 {offsets = [0, 128], sizes = [2, 128], strides = [1, 1]} : vector<2x512xf32> to vector<2x128xf32>
    %176 = arith.negf %175 : vector<2x128xf32>
    %177 = math.exp %176 : vector<2x128xf32>
    %cst_67 = arith.constant 1.000000e+00 : f32
    %178 = vector.broadcast %cst_67 : f32 to vector<2x128xf32>
    %179 = arith.addf %178, %177 : vector<2x128xf32>
    %180 = arith.divf %178, %179 : vector<2x128xf32>
    %181 = vector.extract_strided_slice %168 {offsets = [0, 256], sizes = [2, 128], strides = [1, 1]} : vector<2x512xf32> to vector<2x128xf32>
    %182 = math.tanh %181 : vector<2x128xf32>
    %183 = vector.extract_strided_slice %168 {offsets = [0, 384], sizes = [2, 128], strides = [1, 1]} : vector<2x512xf32> to vector<2x128xf32>
    %184 = arith.negf %183 : vector<2x128xf32>
    %185 = math.exp %184 : vector<2x128xf32>
    %cst_68 = arith.constant 1.000000e+00 : f32
    %186 = vector.broadcast %cst_68 : f32 to vector<2x128xf32>
    %187 = arith.addf %186, %185 : vector<2x128xf32>
    %188 = arith.divf %186, %187 : vector<2x128xf32>
    %189 = arith.mulf %180, %153 : vector<2x128xf32>
    %190 = arith.mulf %174, %182 : vector<2x128xf32>
    %191 = arith.addf %189, %190 : vector<2x128xf32>
    %192 = math.tanh %191 : vector<2x128xf32>
    %193 = arith.mulf %188, %192 : vector<2x128xf32>
    %194 = arith.index_cast %c4_i32 : i32 to index
    %c0_69 = arith.constant 0 : index
    %c0_70 = arith.constant 0 : index
    %195 = vector.load %arg6[%194, %c0_69, %c0_70] : memref<8x2x128xf32, #tpu.memory_space<vmem>>, vector<1x2x128xf32>
    %196 = vector.shape_cast %195 : vector<1x2x128xf32> to vector<2x128xf32>
    %197 = vector.shape_cast %193 : vector<2x128xf32> to vector<1x2x128xf32>
    tpu.vector_store %arg6[%194, %c0_69, %c0_70], %197 {strides = array<i32>} : memref<8x2x128xf32, #tpu.memory_space<vmem>>, vector<1x2x128xf32>,
    %c5_i32 = arith.constant 5 : i32
    %198 = arith.index_cast %c5_i32 : i32 to index
    %c0_71 = arith.constant 0 : index
    %c0_72 = arith.constant 0 : index
    %199 = vector.load %arg2[%198, %c0_71, %c0_72] : memref<8x2x32xf32, #tpu.memory_space<vmem>>, vector<1x2x32xf32>
    %200 = vector.shape_cast %199 : vector<1x2x32xf32> to vector<2x32xf32>
    %c0_73 = arith.constant 0 : index
    %c0_74 = arith.constant 0 : index
    %201 = vector.load %arg3[%c0_73, %c0_74] : memref<32x512xf32, #tpu.memory_space<vmem>>, vector<32x512xf32>
    %cst_75 = arith.constant dense<0.000000e+00> : vector<2x512xf32>
    %202 = tpu.matmul %200, %201, %cst_75 {dimension_numbers = #tpu.dot_dimension_numbers<[1], [0], [0], [1], [0, 0, 1, 1], [], []>} : vector<2x32xf32>, vector<32x512xf32>, vector<2x512xf32> -> vector<2x512xf32>
    %203 = arith.addf %202, %5 : vector<2x512xf32>
    %c0_76 = arith.constant 0 : index
    %c0_77 = arith.constant 0 : index
    %204 = vector.load %arg5[%c0_76, %c0_77] : memref<128x512xf32, #tpu.memory_space<vmem>>, vector<128x512xf32>
    %cst_78 = arith.constant dense<0.000000e+00> : vector<2x512xf32>
    %205 = tpu.matmul %193, %204, %cst_78 {dimension_numbers = #tpu.dot_dimension_numbers<[1], [0], [0], [1], [0, 0, 1, 1], [], []>} : vector<2x128xf32>, vector<128x512xf32>, vector<2x512xf32> -> vector<2x512xf32>
    %206 = arith.addf %203, %205 : vector<2x512xf32>
    %207 = vector.extract_strided_slice %206 {offsets = [0, 0], sizes = [2, 128], strides = [1, 1]} : vector<2x512xf32> to vector<2x128xf32>
    %208 = arith.negf %207 : vector<2x128xf32>
    %209 = math.exp %208 : vector<2x128xf32>
    %cst_79 = arith.constant 1.000000e+00 : f32
    %210 = vector.broadcast %cst_79 : f32 to vector<2x128xf32>
    %211 = arith.addf %210, %209 : vector<2x128xf32>
    %212 = arith.divf %210, %211 : vector<2x128xf32>
    %213 = vector.extract_strided_slice %206 {offsets = [0, 128], sizes = [2, 128], strides = [1, 1]} : vector<2x512xf32> to vector<2x128xf32>
    %214 = arith.negf %213 : vector<2x128xf32>
    %215 = math.exp %214 : vector<2x128xf32>
    %cst_80 = arith.constant 1.000000e+00 : f32
    %216 = vector.broadcast %cst_80 : f32 to vector<2x128xf32>
    %217 = arith.addf %216, %215 : vector<2x128xf32>
    %218 = arith.divf %216, %217 : vector<2x128xf32>
    %219 = vector.extract_strided_slice %206 {offsets = [0, 256], sizes = [2, 128], strides = [1, 1]} : vector<2x512xf32> to vector<2x128xf32>
    %220 = math.tanh %219 : vector<2x128xf32>
    %221 = vector.extract_strided_slice %206 {offsets = [0, 384], sizes = [2, 128], strides = [1, 1]} : vector<2x512xf32> to vector<2x128xf32>
    %222 = arith.negf %221 : vector<2x128xf32>
    %223 = math.exp %222 : vector<2x128xf32>
    %cst_81 = arith.constant 1.000000e+00 : f32
    %224 = vector.broadcast %cst_81 : f32 to vector<2x128xf32>
    %225 = arith.addf %224, %223 : vector<2x128xf32>
    %226 = arith.divf %224, %225 : vector<2x128xf32>
    %227 = arith.mulf %218, %191 : vector<2x128xf32>
    %228 = arith.mulf %212, %220 : vector<2x128xf32>
    %229 = arith.addf %227, %228 : vector<2x128xf32>
    %230 = math.tanh %229 : vector<2x128xf32>
    %231 = arith.mulf %226, %230 : vector<2x128xf32>
    %232 = arith.index_cast %c5_i32 : i32 to index
    %c0_82 = arith.constant 0 : index
    %c0_83 = arith.constant 0 : index
    %233 = vector.load %arg6[%232, %c0_82, %c0_83] : memref<8x2x128xf32, #tpu.memory_space<vmem>>, vector<1x2x128xf32>
    %234 = vector.shape_cast %233 : vector<1x2x128xf32> to vector<2x128xf32>
    %235 = vector.shape_cast %231 : vector<2x128xf32> to vector<1x2x128xf32>
    tpu.vector_store %arg6[%232, %c0_82, %c0_83], %235 {strides = array<i32>} : memref<8x2x128xf32, #tpu.memory_space<vmem>>, vector<1x2x128xf32>,
    %c6_i32 = arith.constant 6 : i32
    %236 = arith.index_cast %c6_i32 : i32 to index
    %c0_84 = arith.constant 0 : index
    %c0_85 = arith.constant 0 : index
    %237 = vector.load %arg2[%236, %c0_84, %c0_85] : memref<8x2x32xf32, #tpu.memory_space<vmem>>, vector<1x2x32xf32>
    %238 = vector.shape_cast %237 : vector<1x2x32xf32> to vector<2x32xf32>
    %c0_86 = arith.constant 0 : index
    %c0_87 = arith.constant 0 : index
    %239 = vector.load %arg3[%c0_86, %c0_87] : memref<32x512xf32, #tpu.memory_space<vmem>>, vector<32x512xf32>
    %cst_88 = arith.constant dense<0.000000e+00> : vector<2x512xf32>
    %240 = tpu.matmul %238, %239, %cst_88 {dimension_numbers = #tpu.dot_dimension_numbers<[1], [0], [0], [1], [0, 0, 1, 1], [], []>} : vector<2x32xf32>, vector<32x512xf32>, vector<2x512xf32> -> vector<2x512xf32>
    %241 = arith.addf %240, %5 : vector<2x512xf32>
    %c0_89 = arith.constant 0 : index
    %c0_90 = arith.constant 0 : index
    %242 = vector.load %arg5[%c0_89, %c0_90] : memref<128x512xf32, #tpu.memory_space<vmem>>, vector<128x512xf32>
    %cst_91 = arith.constant dense<0.000000e+00> : vector<2x512xf32>
    %243 = tpu.matmul %231, %242, %cst_91 {dimension_numbers = #tpu.dot_dimension_numbers<[1], [0], [0], [1], [0, 0, 1, 1], [], []>} : vector<2x128xf32>, vector<128x512xf32>, vector<2x512xf32> -> vector<2x512xf32>
    %244 = arith.addf %241, %243 : vector<2x512xf32>
    %245 = vector.extract_strided_slice %244 {offsets = [0, 0], sizes = [2, 128], strides = [1, 1]} : vector<2x512xf32> to vector<2x128xf32>
    %246 = arith.negf %245 : vector<2x128xf32>
    %247 = math.exp %246 : vector<2x128xf32>
    %cst_92 = arith.constant 1.000000e+00 : f32
    %248 = vector.broadcast %cst_92 : f32 to vector<2x128xf32>
    %249 = arith.addf %248, %247 : vector<2x128xf32>
    %250 = arith.divf %248, %249 : vector<2x128xf32>
    %251 = vector.extract_strided_slice %244 {offsets = [0, 128], sizes = [2, 128], strides = [1, 1]} : vector<2x512xf32> to vector<2x128xf32>
    %252 = arith.negf %251 : vector<2x128xf32>
    %253 = math.exp %252 : vector<2x128xf32>
    %cst_93 = arith.constant 1.000000e+00 : f32
    %254 = vector.broadcast %cst_93 : f32 to vector<2x128xf32>
    %255 = arith.addf %254, %253 : vector<2x128xf32>
    %256 = arith.divf %254, %255 : vector<2x128xf32>
    %257 = vector.extract_strided_slice %244 {offsets = [0, 256], sizes = [2, 128], strides = [1, 1]} : vector<2x512xf32> to vector<2x128xf32>
    %258 = math.tanh %257 : vector<2x128xf32>
    %259 = vector.extract_strided_slice %244 {offsets = [0, 384], sizes = [2, 128], strides = [1, 1]} : vector<2x512xf32> to vector<2x128xf32>
    %260 = arith.negf %259 : vector<2x128xf32>
    %261 = math.exp %260 : vector<2x128xf32>
    %cst_94 = arith.constant 1.000000e+00 : f32
    %262 = vector.broadcast %cst_94 : f32 to vector<2x128xf32>
    %263 = arith.addf %262, %261 : vector<2x128xf32>
    %264 = arith.divf %262, %263 : vector<2x128xf32>
    %265 = arith.mulf %256, %229 : vector<2x128xf32>
    %266 = arith.mulf %250, %258 : vector<2x128xf32>
    %267 = arith.addf %265, %266 : vector<2x128xf32>
    %268 = math.tanh %267 : vector<2x128xf32>
    %269 = arith.mulf %264, %268 : vector<2x128xf32>
    %270 = arith.index_cast %c6_i32 : i32 to index
    %c0_95 = arith.constant 0 : index
    %c0_96 = arith.constant 0 : index
    %271 = vector.load %arg6[%270, %c0_95, %c0_96] : memref<8x2x128xf32, #tpu.memory_space<vmem>>, vector<1x2x128xf32>
    %272 = vector.shape_cast %271 : vector<1x2x128xf32> to vector<2x128xf32>
    %273 = vector.shape_cast %269 : vector<2x128xf32> to vector<1x2x128xf32>
    tpu.vector_store %arg6[%270, %c0_95, %c0_96], %273 {strides = array<i32>} : memref<8x2x128xf32, #tpu.memory_space<vmem>>, vector<1x2x128xf32>,
    %c7_i32 = arith.constant 7 : i32
    %274 = arith.index_cast %c7_i32 : i32 to index
    %c0_97 = arith.constant 0 : index
    %c0_98 = arith.constant 0 : index
    %275 = vector.load %arg2[%274, %c0_97, %c0_98] : memref<8x2x32xf32, #tpu.memory_space<vmem>>, vector<1x2x32xf32>
    %276 = vector.shape_cast %275 : vector<1x2x32xf32> to vector<2x32xf32>
    %c0_99 = arith.constant 0 : index
    %c0_100 = arith.constant 0 : index
    %277 = vector.load %arg3[%c0_99, %c0_100] : memref<32x512xf32, #tpu.memory_space<vmem>>, vector<32x512xf32>
    %cst_101 = arith.constant dense<0.000000e+00> : vector<2x512xf32>
    %278 = tpu.matmul %276, %277, %cst_101 {dimension_numbers = #tpu.dot_dimension_numbers<[1], [0], [0], [1], [0, 0, 1, 1], [], []>} : vector<2x32xf32>, vector<32x512xf32>, vector<2x512xf32> -> vector<2x512xf32>
    %279 = arith.addf %278, %5 : vector<2x512xf32>
    %c0_102 = arith.constant 0 : index
    %c0_103 = arith.constant 0 : index
    %280 = vector.load %arg5[%c0_102, %c0_103] : memref<128x512xf32, #tpu.memory_space<vmem>>, vector<128x512xf32>
    %cst_104 = arith.constant dense<0.000000e+00> : vector<2x512xf32>
    %281 = tpu.matmul %269, %280, %cst_104 {dimension_numbers = #tpu.dot_dimension_numbers<[1], [0], [0], [1], [0, 0, 1, 1], [], []>} : vector<2x128xf32>, vector<128x512xf32>, vector<2x512xf32> -> vector<2x512xf32>
    %282 = arith.addf %279, %281 : vector<2x512xf32>
    %283 = vector.extract_strided_slice %282 {offsets = [0, 0], sizes = [2, 128], strides = [1, 1]} : vector<2x512xf32> to vector<2x128xf32>
    %284 = arith.negf %283 : vector<2x128xf32>
    %285 = math.exp %284 : vector<2x128xf32>
    %cst_105 = arith.constant 1.000000e+00 : f32
    %286 = vector.broadcast %cst_105 : f32 to vector<2x128xf32>
    %287 = arith.addf %286, %285 : vector<2x128xf32>
    %288 = arith.divf %286, %287 : vector<2x128xf32>
    %289 = vector.extract_strided_slice %282 {offsets = [0, 128], sizes = [2, 128], strides = [1, 1]} : vector<2x512xf32> to vector<2x128xf32>
    %290 = arith.negf %289 : vector<2x128xf32>
    %291 = math.exp %290 : vector<2x128xf32>
    %cst_106 = arith.constant 1.000000e+00 : f32
    %292 = vector.broadcast %cst_106 : f32 to vector<2x128xf32>
    %293 = arith.addf %292, %291 : vector<2x128xf32>
    %294 = arith.divf %292, %293 : vector<2x128xf32>
    %295 = vector.extract_strided_slice %282 {offsets = [0, 256], sizes = [2, 128], strides = [1, 1]} : vector<2x512xf32> to vector<2x128xf32>
    %296 = math.tanh %295 : vector<2x128xf32>
    %297 = vector.extract_strided_slice %282 {offsets = [0, 384], sizes = [2, 128], strides = [1, 1]} : vector<2x512xf32> to vector<2x128xf32>
    %298 = arith.negf %297 : vector<2x128xf32>
    %299 = math.exp %298 : vector<2x128xf32>
    %cst_107 = arith.constant 1.000000e+00 : f32
    %300 = vector.broadcast %cst_107 : f32 to vector<2x128xf32>
    %301 = arith.addf %300, %299 : vector<2x128xf32>
    %302 = arith.divf %300, %301 : vector<2x128xf32>
    %303 = arith.mulf %294, %267 : vector<2x128xf32>
    %304 = arith.mulf %288, %296 : vector<2x128xf32>
    %305 = arith.addf %303, %304 : vector<2x128xf32>
    %306 = math.tanh %305 : vector<2x128xf32>
    %307 = arith.mulf %302, %306 : vector<2x128xf32>
    %308 = arith.index_cast %c7_i32 : i32 to index
    %c0_108 = arith.constant 0 : index
    %c0_109 = arith.constant 0 : index
    %309 = vector.load %arg6[%308, %c0_108, %c0_109] : memref<8x2x128xf32, #tpu.memory_space<vmem>>, vector<1x2x128xf32>
    %310 = vector.shape_cast %309 : vector<1x2x128xf32> to vector<2x128xf32>
    %311 = vector.shape_cast %307 : vector<2x128xf32> to vector<1x2x128xf32>
    tpu.vector_store %arg6[%308, %c0_108, %c0_109], %311 {strides = array<i32>} : memref<8x2x128xf32, #tpu.memory_space<vmem>>, vector<1x2x128xf32>,
    %c8_i32 = arith.constant 8 : i32
    %c0_110 = arith.constant 0 : index
    %c0_111 = arith.constant 0 : index
    %312 = vector.load %arg7[%c0_110, %c0_111] : memref<2x128xf32, #tpu.memory_space<vmem>>, vector<2x128xf32>
    tpu.vector_store %arg7[%c0_110, %c0_111], %307 {strides = array<i32>} : memref<2x128xf32, #tpu.memory_space<vmem>>, vector<2x128xf32>,
    %c0_112 = arith.constant 0 : index
    %c0_113 = arith.constant 0 : index
    %313 = vector.load %arg8[%c0_112, %c0_113] : memref<2x128xf32, #tpu.memory_space<vmem>>, vector<2x128xf32>
    tpu.vector_store %arg8[%c0_112, %c0_113], %305 {strides = array<i32>} : memref<2x128xf32, #tpu.memory_space<vmem>>, vector<2x128xf32>,
    return
  }
  func.func @transform_0(%arg0: i32, %arg1: i32) -> (i32, i32, i32) {
    %c0_i32 = arith.constant 0 : i32
    %c0_i32_0 = arith.constant 0 : i32
    return %arg1, %arg0, %c0_i32 : i32, i32, i32
  }
  func.func @transform_1(%arg0: i32, %arg1: i32) -> (i32, i32) {
    %c0_i32 = arith.constant 0 : i32
    %c0_i32_0 = arith.constant 0 : i32
    %c0_i32_1 = arith.constant 0 : i32
    return %c0_i32, %c0_i32_0 : i32, i32
  }
  func.func @transform_2(%arg0: i32, %arg1: i32) -> (i32, i32) {
    %c0_i32 = arith.constant 0 : i32
    %c0_i32_0 = arith.constant 0 : i32
    %c0_i32_1 = arith.constant 0 : i32
    return %c0_i32, %c0_i32_0 : i32, i32
  }
  func.func @transform_3(%arg0: i32, %arg1: i32) -> (i32, i32) {
    %c0_i32 = arith.constant 0 : i32
    %c0_i32_0 = arith.constant 0 : i32
    %c0_i32_1 = arith.constant 0 : i32
    return %c0_i32, %c0_i32_0 : i32, i32
  }
  func.func @transform_4(%arg0: i32, %arg1: i32) -> (i32, i32, i32) {
    %c0_i32 = arith.constant 0 : i32
    %c0_i32_0 = arith.constant 0 : i32
    return %arg1, %arg0, %c0_i32 : i32, i32, i32
  }
}

</mosaic_0001>

<bundles_post_ra>
// kernel: lstm_polymer_forward.3
= control target key start
LH: loop header
LB: loop body
LE: loop exit
PB: predicated region body
PF: predicated region fallthrough
CT: control target
= control target key end

     0   :  { %v194_v3 = vmov 0.0   ;;  %v50_v51 = vlaneseq  ;;  %s332_s1 = inlined_call_operand.vmem [shape: f32[128,256], index: 1, kind: input, shape index: {}]   ;;  %s333_s0 = inlined_call_operand.vmem [shape: f32[16,128], index: 0, kind: input, shape index: {}]   ;;  %s334_s2 = inlined_call_operand.vmem [shape: f32[1,256], index: 2, kind: input, shape index: {}]   ;;  %s335_s3 = inlined_call_operand.vmem [shape: f32[16,256], index: 3, kind: output, shape index: {}]  }
   0x1   :  { %v17_v0 = vld [vmem:[%s332_s1 + $0x8] sm:$0xff]  ;;  %v19_v1 = vld [vmem:[%s332_s1 + $0x18] sm:$0xff]  ;;  %v16_v2 = vld [vmem:[%s332_s1] sm:$0xff]  ;;  %124 = vmatprep.mubr.f32.mxu0 %v194_v3  ;;  %130 = vmatprep.mubr.f32.mxu1 %v194_v3 }
   0x2   :  { %v145_v4 = vpack.c.bf16 %v19_v1, %v17_v0  ;;  %v18_v5 = vld [vmem:[%s332_s1 + $0x10] sm:$0xff]  ;;  %v21_v6 = vld [vmem:[%s332_s1 + $0x28] sm:$0xff]  ;;  %v23_v7 = vld [vmem:[%s332_s1 + $0x38] sm:$0xff]  ;;  %v51_v52 = vshrl.u32 %v50_v51, 7 }
   0x3   :  { %v147_v8 = vpack.c.bf16 %v18_v5, %v16_v2  ;;  %v149_v9 = vpack.c.bf16 %v23_v7, %v21_v6  ;;  %v20_v10 = vld [vmem:[%s332_s1 + $0x20] sm:$0xff]  ;;  %v22_v11 = vld [vmem:[%s332_s1 + $0x30] sm:$0xff]  ;;  %v25_v12 = vld [vmem:[%s332_s1 + $0x48] sm:$0xff] }
   0x4   :  { %146 = vmatprep.subr.bf16.mxu0 %v145_v4  ;;  %177 = vmatprep.subr.bf16.mxu1 %v145_v4  ;;  %v27_v13 = vld [vmem:[%s332_s1 + $0x58] sm:$0xff]  ;;  %v151_v14 = vpack.c.bf16 %v22_v11, %v20_v10  ;;  %v24_v16 = vld [vmem:[%s332_s1 + $0x40] sm:$0xff]  ;;  %v26_v17 = vld [vmem:[%s332_s1 + $0x50] sm:$0xff]  ;;  %v52_v53 = vsub.s32 0, %v51_v52  ;;  %v56_v55 = vsub.s32 1, %v51_v52 }
   0x5   :  { %148 = vmatpush1.bf16.msra.mxu0 %v147_v8  ;;  %185 = vmatpush1.bf16.msra.mxu1 %v147_v8  ;;  %v153_v15 = vpack.c.bf16 %v27_v13, %v25_v12  ;;  %v29_v18 = vld [vmem:[%s332_s1 + $0x68] sm:$0xff]  ;;  %v31_v19 = vld [vmem:[%s332_s1 + $0x78] sm:$0xff]  ;;  %v155_v20 = vpack.c.bf16 %v26_v17, %v24_v16  ;;  %v28_v22 = vld [vmem:[%s332_s1 + $0x60] sm:$0xff] }
   0x6   :  { %150 = vmatprep.subr.bf16.mxu0 %v149_v9  ;;  %178 = vmatprep.subr.bf16.mxu1 %v149_v9  ;;  %v157_v21 = vpack.c.bf16 %v31_v19, %v29_v18  ;;  %v30_v23 = vld [vmem:[%s332_s1 + $0x70] sm:$0xff]  ;;  %v33_v24 = vld [vmem:[%s332_s1 + $0x88] sm:$0xff]  ;;  %v35_v25 = vld [vmem:[%s332_s1 + $0x98] sm:$0xff] }
   0x7   :  { %v159_v26 = vpack.c.bf16 %v30_v23, %v28_v22  ;;  %v161_v27 = vpack.c.bf16 %v35_v25, %v33_v24  ;;  %v32_v28 = vld [vmem:[%s332_s1 + $0x80] sm:$0xff]  ;;  %v34_v29 = vld [vmem:[%s332_s1 + $0x90] sm:$0xff]  ;;  %v37_v30 = vld [vmem:[%s332_s1 + $0xa8] sm:$0xff] }
   0x8   :  { %v39_v31 = vld [vmem:[%s332_s1 + $0xb8] sm:$0xff]  ;;  %v163_v32 = vpack.c.bf16 %v34_v29, %v32_v28  ;;  %v36_v34 = vld [vmem:[%s332_s1 + $0xa0] sm:$0xff]  ;;  %v38_v35 = vld [vmem:[%s332_s1 + $0xb0] sm:$0xff] }
   0x9   :  { %152 = vmatpush1.bf16.msra.mxu0 %v151_v14  ;;  %186 = vmatpush1.bf16.msra.mxu1 %v151_v14  ;;  %v165_v33 = vpack.c.bf16 %v39_v31, %v37_v30  ;;  %v41_v36 = vld [vmem:[%s332_s1 + $0xc8] sm:$0xff]  ;;  %v43_v37 = vld [vmem:[%s332_s1 + $0xd8] sm:$0xff]  ;;  %v167_v38 = vpack.c.bf16 %v38_v35, %v36_v34  ;;  %v40_v40 = vld [vmem:[%s332_s1 + $0xc0] sm:$0xff] }
   0xa   :  { %154 = vmatprep.subr.bf16.mxu0 %v153_v15  ;;  %179 = vmatprep.subr.bf16.mxu1 %v153_v15  ;;  %v169_v39 = vpack.c.bf16 %v43_v37, %v41_v36  ;;  %v42_v41 = vld [vmem:[%s332_s1 + $0xd0] sm:$0xff]  ;;  %v45_v42 = vld [vmem:[%s332_s1 + $0xe8] sm:$0xff]  ;;  %v47_v43 = vld [vmem:[%s332_s1 + $0xf8] sm:$0xff] }
   0xb   :  { %v171_v44 = vpack.c.bf16 %v42_v41, %v40_v40  ;;  %v173_v45 = vpack.c.bf16 %v47_v43, %v45_v42  ;;  %v44_v46 = vld [vmem:[%s332_s1 + $0xe0] sm:$0xff]  ;;  %v46_v47 = vld [vmem:[%s332_s1 + $0xf0] sm:$0xff]  ;;  %v15_v50 = vld [vmem:[%s333_s0 + $0x8] sm:$0xff] }
   0xc   :  { %v175_v48 = vpack.c.bf16 %v46_v47, %v44_v46  ;;  %v14_v49 = vld [vmem:[%s333_s0] sm:$0xff] }
   0xd   :  { %156 = vmatpush1.bf16.msra.mxu0 %v155_v20  ;;  %187 = vmatpush1.bf16.msra.mxu1 %v155_v20  ;;  %v48_v54 = vld [vmem:[%s334_s2] sm:$0x3] }
   0xe   :  { %158 = vmatprep.subr.bf16.mxu0 %v157_v21  ;;  %180 = vmatprep.subr.bf16.mxu1 %v157_v21  ;;  %v53_v56 = vrot.slane %v48_v54, %v52_v53  ;;  %v57_v57 = vrot.slane %v48_v54, %v56_v55 }
  0x11   :  { %160 = vmatpush1.bf16.msra.mxu0 %v159_v26  ;;  %188 = vmatpush1.bf16.msra.mxu1 %v159_v26 }
  0x12   :  { %162 = vmatprep.subr.bf16.mxu0 %v161_v27  ;;  %181 = vmatprep.subr.bf16.mxu1 %v161_v27 }
  0x15   :  { %164 = vmatpush1.bf16.msra.mxu0 %v163_v32  ;;  %189 = vmatpush1.bf16.msra.mxu1 %v163_v32 }
  0x16   :  { %166 = vmatprep.subr.bf16.mxu0 %v165_v33  ;;  %182 = vmatprep.subr.bf16.mxu1 %v165_v33 }
  0x19   :  { %168 = vmatpush1.bf16.msra.mxu0 %v167_v38  ;;  %190 = vmatpush1.bf16.msra.mxu1 %v167_v38 }
  0x1a   :  { %170 = vmatprep.subr.bf16.mxu0 %v169_v39  ;;  %183 = vmatprep.subr.bf16.mxu1 %v169_v39 }
  0x1d   :  { %172 = vmatpush1.bf16.msra.mxu0 %v171_v44  ;;  %191 = vmatpush1.bf16.msra.mxu1 %v171_v44 }
  0x1e   :  { %174 = vmatprep.subr.bf16.mxu0 %v173_v45  ;;  %184 = vmatprep.subr.bf16.mxu1 %v173_v45 }
  0x21   :  { %176 = vmatpush1.bf16.msra.mxu0 %v175_v48  ;;  %192 = vmatpush1.bf16.msra.mxu1 %v175_v48 }
  0x24   :  { %125 = vmatmul.mubr.f32.vlgmr.msra.gmra.mrb[0].mxu0 %v14_v49  ;;  %131 = vmatmul.mubr.f32.vlgmr.msra.gmra.mrb[0].mxu1 %v15_v50 }
  0xf7   :  { %v126_v58 = vpop.f32.mrb[0].mxu0  ;;  %v132_v59 = vpop.f32.mrb[0].mxu1 }
  0xf8   :  { %v127_v60 = vadd.f32 %v126_v58, %v53_v56  ;;  %v133_v61 = vadd.f32 %v132_v59, %v53_v56  ;;  %v128_v62 = vpop.f32.mrb[1].mxu0  ;;  %v134_v63 = vpop.f32.mrb[1].mxu1 }
  0xf9   :  { %v129_v0 = vadd.f32 %v128_v62, %v57_v57  ;;  %v135_v1 = vadd.f32 %v134_v63, %v57_v57 }
  0xfa   :  { %137 = vst [vmem:[%s335_s3] sm:$0xff] %v127_v60  ;;  %139 = vst [vmem:[%s335_s3 + $0x10] sm:$0xff] %v133_v61 }
  0xfb   :  { %138 = vst [vmem:[%s335_s3 + $0x8] sm:$0xff] %v129_v0  ;;  %140 = vst [vmem:[%s335_s3 + $0x18] sm:$0xff] %v135_v1 }

// kernel: lstm_polymer_forward.2
= control target key start
LH: loop header
LB: loop body
LE: loop exit
PB: predicated region body
PF: predicated region fallthrough
CT: control target
= control target key end

     0   :  { %v4131_v3 = vmov 0.0   ;;  %vm64_vm0 = vcmask 261120   ;;  %s5602_s1 = inlined_call_operand.vmem [shape: f32[32,512], index: 1, kind: input, shape index: {}]   ;;  %s5603_s3 = inlined_call_operand.vmem [shape: f32[128,512], index: 3, kind: input, shape index: {}]   ;;  %s5604_s0 = inlined_call_operand.vmem [shape: f32[8,2,32], index: 0, kind: input, shape index: {}]   ;;  %s5605_s2 = inlined_call_operand.vmem [shape: f32[1,512], index: 2, kind: input, shape index: {}]   ;;  %s5606_s4 = inlined_call_operand.vmem [shape: f32[8,2,128], index: 4, kind: output, shape index: {}]  }
   0x1   :  { %v49_v0 = vld [vmem:[%s5602_s1 + $0x8] sm:$0xff]  ;;  %v51_v2 = vld [vmem:[%s5602_s1 + $0x18] sm:$0xff]  ;;  %132 = vmatprep.mubr.f32.mxu0 %v4131_v3  ;;  %21 = vst [vmem:[#allocation2] sm:$0x3] %v4131_v3  ;;  %22 = vst [vmem:[#allocation3] sm:$0x3] %v4131_v3  ;;  %203 = vmatprep.mubr.f32.mxu1 %v4131_v3 }
   0x2   :  { %v53_v1 = vld [vmem:[%s5602_s1 + $0x28] sm:$0xff]  ;;  %v55_v5 = vld [vmem:[%s5602_s1 + $0x38] sm:$0xff]  ;;  %v48_v6 = vld [vmem:[%s5602_s1] sm:$0xff] }
   0x3   :  { %v4170_v4 = vpack.c.bf16 %v53_v1, %v49_v0  ;;  %v52_v7 = vld [vmem:[%s5602_s1 + $0x20] sm:$0xff]  ;;  %v4181_v8 = vpack.c.bf16 %v55_v5, %v51_v2  ;;  %v50_v10 = vld [vmem:[%s5602_s1 + $0x10] sm:$0xff]  ;;  %v57_v12 = vld [vmem:[%s5602_s1 + $0x48] sm:$0xff] }
   0x4   :  { %v4183_v9 = vpack.c.bf16 %v52_v7, %v48_v6  ;;  %v54_v11 = vld [vmem:[%s5602_s1 + $0x30] sm:$0xff]  ;;  %v61_v14 = vld [vmem:[%s5602_s1 + $0x68] sm:$0xff]  ;;  %v59_v15 = vld [vmem:[%s5602_s1 + $0x58] sm:$0xff] }
   0x5   :  { %3299 = vmatprep.subr.bf16.mxu0 %v4170_v4  ;;  %v4195_v13 = vpack.c.bf16 %v54_v11, %v50_v10  ;;  %v63_v16 = vld [vmem:[%s5602_s1 + $0x78] sm:$0xff]  ;;  %3307 = vmatprep.subr.bf16.mxu1 %v4181_v8  ;;  %v4208_v17 = vpack.c.bf16 %v61_v14, %v57_v12  ;;  %v56_v19 = vld [vmem:[%s5602_s1 + $0x40] sm:$0xff]  ;;  %v58_v21 = vld [vmem:[%s5602_s1 + $0x50] sm:$0xff] }
   0x6   :  { %3301 = vmatpush1.bf16.msra.mxu0 %v4183_v9  ;;  %v4210_v18 = vpack.c.bf16 %v63_v16, %v59_v15  ;;  %v60_v20 = vld [vmem:[%s5602_s1 + $0x60] sm:$0xff]  ;;  %v62_v23 = vld [vmem:[%s5602_s1 + $0x70] sm:$0xff]  ;;  %v211_v24 = vld [vmem:[%s5603_s3 + $0x8] sm:$0xff] }
   0x7   :  { %3309 = vmatpush1.bf16.msra.mxu1 %v4195_v13  ;;  %v4222_v22 = vpack.c.bf16 %v60_v20, %v56_v19  ;;  %v215_v25 = vld [vmem:[%s5603_s3 + $0x28] sm:$0xff]  ;;  %3303 = vmatprep.subr.bf16.mxu0 %v4208_v17  ;;  %v4235_v26 = vpack.c.bf16 %v62_v23, %v58_v21  ;;  %v213_v28 = vld [vmem:[%s5603_s3 + $0x18] sm:$0xff]  ;;  %v47_v30 = vld [vmem:[%s5604_s0] sm:$0x3] }
   0x8   :  { %3311 = vmatprep.subr.bf16.mxu1 %v4210_v18  ;;  %v4237_v27 = vpack.c.bf16 %v215_v25, %v211_v24  ;;  %v217_v29 = vld [vmem:[%s5603_s3 + $0x38] sm:$0xff]  ;;  %v210_v32 = vld [vmem:[%s5603_s3] sm:$0xff]  ;;  %v212_v34 = vld [vmem:[%s5603_s3 + $0x10] sm:$0xff] }
   0x9   :  { %v4248_v31 = vpack.c.bf16 %v217_v29, %v213_v28  ;;  %v214_v33 = vld [vmem:[%s5603_s3 + $0x20] sm:$0xff]  ;;  %v216_v36 = vld [vmem:[%s5603_s3 + $0x30] sm:$0xff]  ;;  %v219_v37 = vld [vmem:[%s5603_s3 + $0x48] sm:$0xff] }
   0xa   :  { %3305 = vmatpush1.bf16.msra.mxu0 %v4222_v22  ;;  %v4260_v35 = vpack.c.bf16 %v214_v33, %v210_v32  ;;  %v223_v38 = vld [vmem:[%s5603_s3 + $0x68] sm:$0xff]  ;;  %v4273_v39 = vpack.c.bf16 %v216_v36, %v212_v34  ;;  %v221_v41 = vld [vmem:[%s5603_s3 + $0x58] sm:$0xff]  ;;  %v218_v43 = vld [vmem:[%s5603_s3 + $0x40] sm:$0xff] }
   0xb   :  { %3313 = vmatpush1.bf16.msra.mxu1 %v4235_v26  ;;  %3315 = vmatprep.subr.bf16.mxu0 %v4237_v27  ;;  %v4275_v40 = vpack.c.bf16 %v223_v38, %v219_v37  ;;  %v225_v42 = vld [vmem:[%s5603_s3 + $0x78] sm:$0xff]  ;;  %v222_v45 = vld [vmem:[%s5603_s3 + $0x60] sm:$0xff]  ;;  %v220_v46 = vld [vmem:[%s5603_s3 + $0x50] sm:$0xff] }
   0xc   :  { %3347 = vmatprep.subr.bf16.mxu1 %v4248_v31  ;;  %v4287_v44 = vpack.c.bf16 %v225_v42, %v221_v41  ;;  %v224_v47 = vld [vmem:[%s5603_s3 + $0x70] sm:$0xff]  ;;  %v227_v48 = vld [vmem:[%s5603_s3 + $0x88] sm:$0xff]  ;;  %v229_v50 = vld [vmem:[%s5603_s3 + $0x98] sm:$0xff]  ;;  %v4310_v51 = vpack.c.bf16 %v222_v45, %v218_v43 }
   0xd   :  { %3244 = vmatmul.mubr.msk.f32.vlgmr.msra.gmra.mrb[0].mxu0 %vm64_vm0, %v47_v30  ;;  %v231_v49 = vld [vmem:[%s5603_s3 + $0xa8] sm:$0xff]  ;;  %v233_v52 = vld [vmem:[%s5603_s3 + $0xb8] sm:$0xff]  ;;  %v4317_v53 = vpack.c.bf16 %v224_v47, %v220_v46  ;;  %v226_v55 = vld [vmem:[%s5603_s3 + $0x80] sm:$0xff] }
   0xe   :  { %3245 = vmatmul.mubr.msk.f32.vlgmr.msra.gmra.mrb[0].mxu1 %vm64_vm0, %v47_v30  ;;  %3317 = vmatpush1.bf16.msra.mxu0 %v4260_v35  ;;  %v4319_v54 = vpack.c.bf16 %v231_v49, %v227_v48  ;;  %v230_v56 = vld [vmem:[%s5603_s3 + $0xa0] sm:$0xff]  ;;  %v228_v57 = vld [vmem:[%s5603_s3 + $0x90] sm:$0xff]  ;;  %v4331_v58 = vpack.c.bf16 %v233_v52, %v229_v50  ;;  %v235_v60 = vld [vmem:[%s5603_s3 + $0xc8] sm:$0xff] }
   0xf   :  { %3349 = vmatpush1.bf16.msra.mxu1 %v4273_v39  ;;  %3319 = vmatprep.subr.bf16.mxu0 %v4275_v40  ;;  %v232_v59 = vld [vmem:[%s5603_s3 + $0xb0] sm:$0xff]  ;;  %v239_v61 = vld [vmem:[%s5603_s3 + $0xe8] sm:$0xff]  ;;  %v237_v62 = vld [vmem:[%s5603_s3 + $0xd8] sm:$0xff]  ;;  %v4351_v0 = vpack.c.bf16 %v230_v56, %v226_v55 }
  0x10   :  { %3351 = vmatprep.subr.bf16.mxu1 %v4287_v44  ;;  %338 = vmatprep.mubr.f32.mxu0 %v4131_v3  ;;  %v241_v63 = vld [vmem:[%s5603_s3 + $0xf8] sm:$0xff]  ;;  %v4355_v1 = vpack.c.bf16 %v232_v59, %v228_v57  ;;  %v4357_v2 = vpack.c.bf16 %v239_v61, %v235_v60  ;;  %v234_v5 = vld [vmem:[%s5603_s3 + $0xc0] sm:$0xff]  ;;  %v236_v7 = vld [vmem:[%s5603_s3 + $0xd0] sm:$0xff] }
  0x11   :  { %409 = vmatprep.mubr.f32.mxu1 %v4131_v3  ;;  %v238_v6 = vld [vmem:[%s5603_s3 + $0xe0] sm:$0xff]  ;;  %v4369_v10 = vpack.c.bf16 %v241_v63, %v237_v62  ;;  %v240_v11 = vld [vmem:[%s5603_s3 + $0xf0] sm:$0xff]  ;;  %v243_v12 = vld [vmem:[%s5603_s3 + $0x108] sm:$0xff] }
  0x12   :  { %3321 = vmatpush1.bf16.msra.mxu0 %v4310_v51  ;;  %v247_v14 = vld [vmem:[%s5603_s3 + $0x128] sm:$0xff]  ;;  %v245_v15 = vld [vmem:[%s5603_s3 + $0x118] sm:$0xff]  ;;  %v4387_v19 = vpack.c.bf16 %v238_v6, %v234_v5  ;;  %v4391_v20 = vpack.c.bf16 %v240_v11, %v236_v7  ;;  %v242_v23 = vld [vmem:[%s5603_s3 + $0x100] sm:$0xff] }
  0x13   :  { %3353 = vmatpush1.bf16.msra.mxu1 %v4317_v53  ;;  %3323 = vmatprep.subr.bf16.mxu0 %v4319_v54  ;;  %v249_v16 = vld [vmem:[%s5603_s3 + $0x138] sm:$0xff]  ;;  %v4393_v21 = vpack.c.bf16 %v247_v14, %v243_v12  ;;  %v246_v24 = vld [vmem:[%s5603_s3 + $0x120] sm:$0xff]  ;;  %v244_v25 = vld [vmem:[%s5603_s3 + $0x110] sm:$0xff] }
  0x14   :  { %3355 = vmatprep.subr.bf16.mxu1 %v4331_v58  ;;  %v4405_v28 = vpack.c.bf16 %v249_v16, %v245_v15  ;;  %v248_v29 = vld [vmem:[%s5603_s3 + $0x130] sm:$0xff]  ;;  %v251_v30 = vld [vmem:[%s5603_s3 + $0x148] sm:$0xff]  ;;  %v253_v33 = vld [vmem:[%s5603_s3 + $0x158] sm:$0xff]  ;;  %v4423_v36 = vpack.c.bf16 %v246_v24, %v242_v23 }
  0x15   :  { %v255_v32 = vld [vmem:[%s5603_s3 + $0x168] sm:$0xff]  ;;  %v257_v34 = vld [vmem:[%s5603_s3 + $0x178] sm:$0xff]  ;;  %v4427_v37 = vpack.c.bf16 %v248_v29, %v244_v25  ;;  %v250_v41 = vld [vmem:[%s5603_s3 + $0x140] sm:$0xff] }
  0x16   :  { %3325 = vmatpush1.bf16.msra.mxu0 %v4351_v0  ;;  %v4429_v38 = vpack.c.bf16 %v255_v32, %v251_v30  ;;  %v254_v42 = vld [vmem:[%s5603_s3 + $0x160] sm:$0xff]  ;;  %v252_v43 = vld [vmem:[%s5603_s3 + $0x150] sm:$0xff]  ;;  %v4441_v45 = vpack.c.bf16 %v257_v34, %v253_v33  ;;  %v259_v47 = vld [vmem:[%s5603_s3 + $0x188] sm:$0xff]  ;;  %v25_v34 = vlaneseq }
  0x17   :  { %3357 = vmatpush1.bf16.msra.mxu1 %v4355_v1  ;;  %3327 = vmatprep.subr.bf16.mxu0 %v4357_v2  ;;  %v256_v46 = vld [vmem:[%s5603_s3 + $0x170] sm:$0xff]  ;;  %v263_v48 = vld [vmem:[%s5603_s3 + $0x1a8] sm:$0xff]  ;;  %v261_v49 = vld [vmem:[%s5603_s3 + $0x198] sm:$0xff]  ;;  %v4459_v52 = vpack.c.bf16 %v254_v42, %v250_v41 }
  0x18   :  { %3359 = vmatprep.subr.bf16.mxu1 %v4369_v10  ;;  %v265_v50 = vld [vmem:[%s5603_s3 + $0x1b8] sm:$0xff]  ;;  %v4463_v55 = vpack.c.bf16 %v256_v46, %v252_v43  ;;  %v4465_v56 = vpack.c.bf16 %v263_v48, %v259_v47  ;;  %v258_v57 = vld [vmem:[%s5603_s3 + $0x180] sm:$0xff]  ;;  %v260_v60 = vld [vmem:[%s5603_s3 + $0x190] sm:$0xff]  ;;  %v26_v41 = vshrl.u32 %v25_v34, 7 }
  0x19   :  { %v262_v59 = vld [vmem:[%s5603_s3 + $0x1a0] sm:$0xff]  ;;  %v4477_v61 = vpack.c.bf16 %v265_v50, %v261_v49  ;;  %v264_v62 = vld [vmem:[%s5603_s3 + $0x1b0] sm:$0xff]  ;;  %v267_v63 = vld [vmem:[%s5603_s3 + $0x1c8] sm:$0xff] }
  0x1a   :  { %3329 = vmatpush1.bf16.msra.mxu0 %v4387_v19  ;;  %v271_v5 = vld [vmem:[%s5603_s3 + $0x1e8] sm:$0xff]  ;;  %v269_v6 = vld [vmem:[%s5603_s3 + $0x1d8] sm:$0xff]  ;;  %v4495_v11 = vpack.c.bf16 %v262_v59, %v258_v57  ;;  %v4499_v12 = vpack.c.bf16 %v264_v62, %v260_v60  ;;  %v266_v15 = vld [vmem:[%s5603_s3 + $0x1c0] sm:$0xff]  ;;  %v27_v42 = vsub.s32 0, %v26_v41  ;;  %v31_v46 = vsub.s32 1, %v26_v41 }
  0x1b   :  { %3361 = vmatpush1.bf16.msra.mxu1 %v4391_v20  ;;  %3331 = vmatprep.subr.bf16.mxu0 %v4393_v21  ;;  %v273_v7 = vld [vmem:[%s5603_s3 + $0x1f8] sm:$0xff]  ;;  %v4501_v14 = vpack.c.bf16 %v271_v5, %v267_v63  ;;  %v270_v16 = vld [vmem:[%s5603_s3 + $0x1e0] sm:$0xff]  ;;  %v268_v24 = vld [vmem:[%s5603_s3 + $0x1d0] sm:$0xff]  ;;  %v39_v50 = vsub.s32 3, %v26_v41 }
  0x1c   :  { %3363 = vmatprep.subr.bf16.mxu1 %v4405_v28  ;;  %v4510_v23 = vpack.c.bf16 %v273_v7, %v269_v6  ;;  %v272_v25 = vld [vmem:[%s5603_s3 + $0x1f0] sm:$0xff]  ;;  %v4519_v29 = vpack.c.bf16 %v270_v16, %v266_v15  ;;  %v45_v32 = vld [vmem:[#allocation2] sm:$0x3]  ;;  %v3249_v33 = vld [vmem:[%s5604_s0 + $0x2] sm:$0x3]  ;;  %v35_v6 = vsub.s32 2, %v26_v41 }
  0x1d   :  { %v4523_v30 = vpack.c.bf16 %v272_v25, %v268_v24  ;;  %v23_v43 = vld [vmem:[%s5605_s2] sm:$0xf] }
  0x1e   :  { %3333 = vmatpush1.bf16.msra.mxu0 %v4423_v36  ;;  %v4582_v47 = vrot.slane %v23_v43, %v27_v42  ;;  %v4584_v48 = vrot.slane %v23_v43, %v31_v46  ;;  %v4588_v5 = vrot.slane %v23_v43, %v39_v50  ;;  %v4591_v15 = vrot.slane %v23_v43, %v35_v6  ;;  %v1254_v6 = vld [vmem:[%s5602_s1 + $0x48] sm:$0xff] }
  0x1f   :  { %3365 = vmatpush1.bf16.msra.mxu1 %v4427_v37  ;;  %3335 = vmatprep.subr.bf16.mxu0 %v4429_v38 }
  0x20   :  { %3367 = vmatprep.subr.bf16.mxu1 %v4441_v45 }
  0x22   :  { %3337 = vmatpush1.bf16.msra.mxu0 %v4459_v52 }
  0x23   :  { %3369 = vmatpush1.bf16.msra.mxu1 %v4463_v55  ;;  %3339 = vmatprep.subr.bf16.mxu0 %v4465_v56 }
  0x24   :  { %3371 = vmatprep.subr.bf16.mxu1 %v4477_v61 }
  0x26   :  { %3341 = vmatpush1.bf16.msra.mxu0 %v4495_v11 }
  0x27   :  { %3373 = vmatpush1.bf16.msra.mxu1 %v4499_v12  ;;  %3343 = vmatprep.subr.bf16.mxu0 %v4501_v14 }
  0x28   :  { %3375 = vmatprep.subr.bf16.mxu1 %v4510_v23 }
  0x2a   :  { %3345 = vmatpush1.bf16.msra.mxu0 %v4519_v29 }
  0x2b   :  { %3377 = vmatpush1.bf16.msra.mxu1 %v4523_v30  ;;  %3379 = vmatprep.subr.bf16.mxu0 %v4170_v4 }
  0x2c   :  { %3387 = vmatprep.subr.bf16.mxu1 %v4181_v8 }
  0x2d   :  { %339 = vmatmul.mubr.f32.vlgmr.msra.gmra.mrb[0].mxu0 %v45_v32 }
  0x2e   :  { %410 = vmatmul.mubr.f32.vlgmr.msra.gmra.mrb[0].mxu1 %v45_v32  ;;  %3381 = vmatpush1.bf16.msra.mxu0 %v4183_v9 }
  0x2f   :  { %3389 = vmatpush1.bf16.msra.mxu1 %v4195_v13  ;;  %3383 = vmatprep.subr.bf16.mxu0 %v4208_v17 }
  0x30   :  { %3391 = vmatprep.subr.bf16.mxu1 %v4210_v18  ;;  %530 = vmatprep.mubr.f32.mxu0 %v4131_v3 }
  0x31   :  { %601 = vmatprep.mubr.f32.mxu1 %v4131_v3 }
  0x32   :  { %3385 = vmatpush1.bf16.msra.mxu0 %v4222_v22 }
  0x33   :  { %3393 = vmatpush1.bf16.msra.mxu1 %v4235_v26  ;;  %3395 = vmatprep.subr.bf16.mxu0 %v4237_v27 }
  0x34   :  { %3427 = vmatprep.subr.bf16.mxu1 %v4248_v31 }
  0x35   :  { %3250 = vmatmul.mubr.msk.f32.vlgmr.msra.gmra.mrb[2].mxu0 %vm64_vm0, %v3249_v33 }
  0x36   :  { %3251 = vmatmul.mubr.msk.f32.vlgmr.msra.gmra.mrb[2].mxu1 %vm64_vm0, %v3249_v33  ;;  %3397 = vmatpush1.bf16.msra.mxu0 %v4260_v35 }
  0x37   :  { %3429 = vmatpush1.bf16.msra.mxu1 %v4273_v39  ;;  %3399 = vmatprep.subr.bf16.mxu0 %v4275_v40 }
  0x38   :  { %3431 = vmatprep.subr.bf16.mxu1 %v4287_v44  ;;  %736 = vmatprep.mubr.f32.mxu0 %v4131_v3 }
  0x39   :  { %807 = vmatprep.mubr.f32.mxu1 %v4131_v3 }
  0x3a   :  { %3401 = vmatpush1.bf16.msra.mxu0 %v4310_v51 }
  0x3b   :  { %3433 = vmatpush1.bf16.msra.mxu1 %v4317_v53  ;;  %3403 = vmatprep.subr.bf16.mxu0 %v4319_v54 }
  0x3c   :  { %3435 = vmatprep.subr.bf16.mxu1 %v4331_v58 }
  0x3e   :  { %3405 = vmatpush1.bf16.msra.mxu0 %v4351_v0 }
  0x3f   :  { %3437 = vmatpush1.bf16.msra.mxu1 %v4355_v1  ;;  %3407 = vmatprep.subr.bf16.mxu0 %v4357_v2 }
  0x40   :  { %3439 = vmatprep.subr.bf16.mxu1 %v4369_v10 }
  0x42   :  { %3409 = vmatpush1.bf16.msra.mxu0 %v4387_v19 }
  0x43   :  { %3441 = vmatpush1.bf16.msra.mxu1 %v4391_v20  ;;  %3411 = vmatprep.subr.bf16.mxu0 %v4393_v21 }
  0x44   :  { %3443 = vmatprep.subr.bf16.mxu1 %v4405_v28 }
  0x46   :  { %3413 = vmatpush1.bf16.msra.mxu0 %v4423_v36 }
  0x47   :  { %3445 = vmatpush1.bf16.msra.mxu1 %v4427_v37  ;;  %3415 = vmatprep.subr.bf16.mxu0 %v4429_v38 }
  0x48   :  { %3447 = vmatprep.subr.bf16.mxu1 %v4441_v45 }
  0x4a   :  { %3417 = vmatpush1.bf16.msra.mxu0 %v4459_v52 }
  0x4b   :  { %3449 = vmatpush1.bf16.msra.mxu1 %v4463_v55  ;;  %3419 = vmatprep.subr.bf16.mxu0 %v4465_v56 }
  0x4c   :  { %3451 = vmatprep.subr.bf16.mxu1 %v4477_v61 }
  0x4e   :  { %3421 = vmatpush1.bf16.msra.mxu0 %v4495_v11 }
  0x4f   :  { %3453 = vmatpush1.bf16.msra.mxu1 %v4499_v12  ;;  %3423 = vmatprep.subr.bf16.mxu0 %v4501_v14 }
  0x50   :  { %3455 = vmatprep.subr.bf16.mxu1 %v4510_v23 }
  0x52   :  { %3425 = vmatpush1.bf16.msra.mxu0 %v4519_v29 }
  0x53   :  { %3457 = vmatpush1.bf16.msra.mxu1 %v4523_v30  ;;  %3459 = vmatprep.subr.bf16.mxu0 %v4170_v4 }
  0x54   :  { %3467 = vmatprep.subr.bf16.mxu1 %v4181_v8 }
 0x100   :  { %v340_v49 = vpop.f32.mrb[0].mxu0 }
 0x101   :  { %v3938_v57 = vadd.f32 %v340_v49, %v4582_v47  ;;  %v411_v59 = vpop.f32.mrb[0].mxu1  ;;  %v342_v4 = vpop.f32.mrb[1].mxu0  ;;  %v46_v49 = vld [vmem:[#allocation3] sm:$0x3] }
 0x102   :  { %v3939_v8 = vadd.f32 %v342_v4, %v4584_v48  ;;  %v413_v60 = vpop.f32.mrb[1].mxu1  ;;  %v3940_v24 = vadd.f32 %v411_v59, %v4591_v15 }
 0x103   :  { %v3246_v62 = vmul.f32 -1.442695, %v3938_v57  ;;  %v3941_v7 = vadd.f32 %v413_v60, %v4588_v5 }
 0x104   :  { %v3247_v63 = vmul.f32 -1.442695, %v3939_v8 }
 0x105   :  { %4003 = vpow2.f32 %v3246_v62  ;;  %v3248_v16 = vmul.f32 -1.442695, %v3941_v7  ;;  %v1258_v7 = vld [vmem:[%s5602_s1 + $0x68] sm:$0xff] }
 0x106   :  { %4005 = vpow2.f32 %v3247_v63 }
 0x107   :  { %4007 = vpow2.f32 %v3248_v16  ;;  %v1256_v16 = vld [vmem:[%s5602_s1 + $0x58] sm:$0xff] }
 0x108   :  { %4009 = vtanh.f32 %v3940_v24  ;;  %v4705_v24 = vpack.c.bf16 %v1258_v7, %v1254_v6  ;;  %v1430_v6 = vld [vmem:[%s5603_s3 + $0xc0] sm:$0xff] }
 0x109   :  { %v1434_v7 = vld [vmem:[%s5603_s3 + $0xe0] sm:$0xff] }
 0x10f   :  { %v4004_v25 = vpop.eup %4003 }
 0x110   :  { %v4006_v32 = vpop.eup %4005  ;;  %v423_v33 = vadd.f32 1.0, %v4004_v25  ;;  %v1260_v25 = vld [vmem:[%s5602_s1 + $0x78] sm:$0xff] }
 0x111   :  { %v429_v34 = vadd.f32 1.0, %v4006_v32  ;;  %v4008_v42 = vpop.eup %4007  ;;  %v1253_v32 = vld [vmem:[%s5602_s1 + $0x40] sm:$0xff] }
 0x112   :  { %4011 = vrcp.f32 %v423_v33  ;;  %v4010_v46 = vpop.eup %4009  ;;  %v436_v4 = vadd.f32 1.0, %v4008_v42  ;;  %v1257_v33 = vld [vmem:[%s5602_s1 + $0x60] sm:$0xff] }
 0x113   :  { %4013 = vrcp.f32 %v429_v34  ;;  %v4716_v34 = vpack.c.bf16 %v1260_v25, %v1256_v16  ;;  %v4718_v42 = vpack.c.bf16 %v1257_v33, %v1253_v32  ;;  %v4869_v25 = vpack.c.bf16 %v1434_v7, %v1430_v6  ;;  %v1432_v32 = vld [vmem:[%s5603_s3 + $0xd0] sm:$0xff]  ;;  %v1454_v6 = vld [vmem:[%s5603_s3 + $0x180] sm:$0xff] }
 0x114   :  { %4015 = vrcp.f32 %v436_v4  ;;  %v1409_v4 = vld [vmem:[%s5603_s3 + $0x18] sm:$0xff]  ;;  %v1436_v33 = vld [vmem:[%s5603_s3 + $0xf0] sm:$0xff]  ;;  %v1458_v7 = vld [vmem:[%s5603_s3 + $0x1a0] sm:$0xff] }
 0x11c   :  { %v4012_v41 = vpop.eup %4011 }
 0x11d   :  { %v4014_v50 = vpop.eup %4013  ;;  %v440_v57 = vmul.f32 %v4012_v41, %v4010_v46  ;;  %v1255_v46 = vld [vmem:[%s5602_s1 + $0x50] sm:$0xff] }
 0x11e   :  { %v439_v43 = vmul.f32 %v4014_v50, %v46_v49  ;;  %v4016_v59 = vpop.eup %4015  ;;  %v1259_v49 = vld [vmem:[%s5602_s1 + $0x70] sm:$0xff]  ;;  %v1407_v50 = vld [vmem:[%s5603_s3 + $0x8] sm:$0xff] }
 0x11f   :  { %v4727_v41 = vpack.c.bf16 %v1259_v49, %v1255_v46  ;;  %v4878_v46 = vpack.c.bf16 %v1436_v33, %v1432_v32  ;;  %v1439_v49 = vld [vmem:[%s5603_s3 + $0x108] sm:$0xff]  ;;  %v1456_v32 = vld [vmem:[%s5603_s3 + $0x190] sm:$0xff] }
 0x120   :  { %v4594_v8 = vadd.f32 %v440_v57, %v439_v43  ;;  %v1411_v57 = vld [vmem:[%s5603_s3 + $0x28] sm:$0xff]  ;;  %v1460_v33 = vld [vmem:[%s5603_s3 + $0x1b0] sm:$0xff] }
 0x121   :  { %v4741_v43 = vpack.c.bf16 %v1411_v57, %v1407_v50  ;;  %v1443_v50 = vld [vmem:[%s5603_s3 + $0x128] sm:$0xff]  ;;  %v1441_v57 = vld [vmem:[%s5603_s3 + $0x118] sm:$0xff] }
 0x122   :  { %4017 = vtanh.f32 %v4594_v8 }
 0x12c   :  { %v4018_v60 = vpop.eup %4017 }
 0x12d   :  { %v443_v62 = vmul.f32 %v4018_v60, %v4016_v59  ;;  %v1406_v59 = vld [vmem:[%s5603_s3] sm:$0xff] }
 0x12e   :  { %v1410_v60 = vld [vmem:[%s5603_s3 + $0x20] sm:$0xff] }
 0x12f   :  { %444 = vst [vmem:[%s5606_s4] sm:$0x3] %v443_v62  ;;  %737 = vmatmul.mubr.f32.vlgmr.msra.gmra.mrb[2].mxu0 %v443_v62  ;;  %808 = vmatmul.mubr.f32.vlgmr.msra.gmra.mrb[2].mxu1 %v443_v62 }
 0x130   :  { %3461 = vmatpush1.bf16.msra.mxu0 %v4183_v9  ;;  %3469 = vmatpush1.bf16.msra.mxu1 %v4195_v13  ;;  %v3256_v9 = vld [vmem:[%s5604_s0 + $0x4] sm:$0x3] }
 0x131   :  { %3463 = vmatprep.subr.bf16.mxu0 %v4208_v17  ;;  %3471 = vmatprep.subr.bf16.mxu1 %v4210_v18 }
 0x132   :  { %929 = vmatprep.mubr.f32.mxu0 %v4131_v3  ;;  %1000 = vmatprep.mubr.f32.mxu1 %v4131_v3 }
 0x134   :  { %3465 = vmatpush1.bf16.msra.mxu0 %v4222_v22  ;;  %3473 = vmatpush1.bf16.msra.mxu1 %v4235_v26 }
 0x135   :  { %3475 = vmatprep.subr.bf16.mxu0 %v4237_v27  ;;  %3507 = vmatprep.subr.bf16.mxu1 %v4248_v31 }
 0x137   :  { %3257 = vmatmul.mubr.msk.f32.vlgmr.msra.gmra.mrb[4].mxu0 %vm64_vm0, %v3256_v9  ;;  %3258 = vmatmul.mubr.msk.f32.vlgmr.msra.gmra.mrb[4].mxu1 %vm64_vm0, %v3256_v9  ;;  %v4754_v9 = vpack.c.bf16 %v1410_v60, %v1406_v59  ;;  %v1438_v59 = vld [vmem:[%s5603_s3 + $0x100] sm:$0xff] }
 0x138   :  { %3477 = vmatpush1.bf16.msra.mxu0 %v4260_v35  ;;  %3509 = vmatpush1.bf16.msra.mxu1 %v4273_v39  ;;  %v1442_v60 = vld [vmem:[%s5603_s3 + $0x120] sm:$0xff] }
 0x139   :  { %3479 = vmatprep.subr.bf16.mxu0 %v4275_v40  ;;  %3511 = vmatprep.subr.bf16.mxu1 %v4287_v44 }
 0x13a   :  { %1135 = vmatprep.mubr.f32.mxu0 %v4131_v3  ;;  %1206 = vmatprep.mubr.f32.mxu1 %v4131_v3 }
 0x13c   :  { %3481 = vmatpush1.bf16.msra.mxu0 %v4310_v51  ;;  %3513 = vmatpush1.bf16.msra.mxu1 %v4317_v53 }
 0x13d   :  { %3483 = vmatprep.subr.bf16.mxu0 %v4319_v54  ;;  %3515 = vmatprep.subr.bf16.mxu1 %v4331_v58 }
 0x140   :  { %3485 = vmatpush1.bf16.msra.mxu0 %v4351_v0  ;;  %3517 = vmatpush1.bf16.msra.mxu1 %v4355_v1 }
 0x141   :  { %3487 = vmatprep.subr.bf16.mxu0 %v4357_v2  ;;  %3519 = vmatprep.subr.bf16.mxu1 %v4369_v10 }
 0x144   :  { %3489 = vmatpush1.bf16.msra.mxu0 %v4387_v19  ;;  %3521 = vmatpush1.bf16.msra.mxu1 %v4391_v20 }
 0x145   :  { %3491 = vmatprep.subr.bf16.mxu0 %v4393_v21  ;;  %3523 = vmatprep.subr.bf16.mxu1 %v4405_v28 }
 0x148   :  { %3493 = vmatpush1.bf16.msra.mxu0 %v4423_v36  ;;  %3525 = vmatpush1.bf16.msra.mxu1 %v4427_v37 }
 0x149   :  { %3495 = vmatprep.subr.bf16.mxu0 %v4429_v38  ;;  %3527 = vmatprep.subr.bf16.mxu1 %v4441_v45  ;;  %v1246_v45 = vld [vmem:[%s5602_s1 + $0x8] sm:$0xff] }
 0x14c   :  { %3497 = vmatpush1.bf16.msra.mxu0 %v4459_v52  ;;  %3529 = vmatpush1.bf16.msra.mxu1 %v4463_v55  ;;  %v1250_v52 = vld [vmem:[%s5602_s1 + $0x28] sm:$0xff]  ;;  %v1248_v55 = vld [vmem:[%s5602_s1 + $0x18] sm:$0xff] }
 0x14d   :  { %3499 = vmatprep.subr.bf16.mxu0 %v4465_v56  ;;  %3531 = vmatprep.subr.bf16.mxu1 %v4477_v61  ;;  %v4669_v56 = vpack.c.bf16 %v1250_v52, %v1246_v45  ;;  %v1252_v61 = vld [vmem:[%s5602_s1 + $0x38] sm:$0xff]  ;;  %v1424_v45 = vld [vmem:[%s5603_s3 + $0x90] sm:$0xff] }
 0x14e   :  { %v1428_v52 = vld [vmem:[%s5603_s3 + $0xb0] sm:$0xff] }
 0x150   :  { %3501 = vmatpush1.bf16.msra.mxu0 %v4495_v11  ;;  %3533 = vmatpush1.bf16.msra.mxu1 %v4499_v12  ;;  %v1245_v11 = vld [vmem:[%s5602_s1] sm:$0xff] }
 0x151   :  { %3503 = vmatprep.subr.bf16.mxu0 %v4501_v14  ;;  %3535 = vmatprep.subr.bf16.mxu1 %v4510_v23  ;;  %v1249_v12 = vld [vmem:[%s5602_s1 + $0x20] sm:$0xff]  ;;  %v4680_v14 = vpack.c.bf16 %v1252_v61, %v1248_v55  ;;  %v4842_v55 = vpack.c.bf16 %v1428_v52, %v1424_v45  ;;  %v1431_v61 = vld [vmem:[%s5603_s3 + $0xc8] sm:$0xff] }
 0x152   :  { %v4682_v23 = vpack.c.bf16 %v1249_v12, %v1245_v11  ;;  %v1435_v11 = vld [vmem:[%s5603_s3 + $0xe8] sm:$0xff]  ;;  %v1433_v12 = vld [vmem:[%s5603_s3 + $0xd8] sm:$0xff] }
 0x153   :  { %v1459_v52 = vld [vmem:[%s5603_s3 + $0x1a8] sm:$0xff] }
 0x154   :  { %3505 = vmatpush1.bf16.msra.mxu0 %v4519_v29  ;;  %3537 = vmatpush1.bf16.msra.mxu1 %v4523_v30  ;;  %v1247_v29 = vld [vmem:[%s5602_s1 + $0x10] sm:$0xff] }
 0x155   :  { %v1251_v30 = vld [vmem:[%s5602_s1 + $0x30] sm:$0xff]  ;;  %3539 = vmatprep.subr.bf16.mxu0 %v4669_v56  ;;  %3547 = vmatprep.subr.bf16.mxu1 %v4680_v14 }
 0x156   :  { %v4691_v63 = vpack.c.bf16 %v1251_v30, %v1247_v29  ;;  %v4855_v29 = vpack.c.bf16 %v1435_v11, %v1431_v61  ;;  %v1437_v30 = vld [vmem:[%s5603_s3 + $0xf8] sm:$0xff] }
 0x157   :  { %v4867_v16 = vpack.c.bf16 %v1437_v30, %v1433_v12  ;;  %v1457_v61 = vld [vmem:[%s5603_s3 + $0x198] sm:$0xff] }
 0x158   :  { %v1461_v11 = vld [vmem:[%s5603_s3 + $0x1b8] sm:$0xff] }
 0x159   :  { %v4967_v30 = vpack.c.bf16 %v1461_v11, %v1457_v61 }
 0x202   :  { %v738_v13 = vpop.f32.mrb[2].mxu0  ;;  %v809_v17 = vpop.f32.mrb[2].mxu1 }
 0x203   :  { %v3942_v18 = vadd.f32 %v738_v13, %v4582_v47  ;;  %v740_v22 = vpop.f32.mrb[3].mxu0  ;;  %v811_v26 = vpop.f32.mrb[3].mxu1  ;;  %v3944_v44 = vadd.f32 %v809_v17, %v4591_v15  ;;  %v1408_v13 = vld [vmem:[%s5603_s3 + $0x10] sm:$0xff] }
 0x204   :  { %v3943_v27 = vadd.f32 %v740_v22, %v4584_v48  ;;  %v3945_v39 = vadd.f32 %v811_v26, %v4588_v5  ;;  %v1412_v17 = vld [vmem:[%s5603_s3 + $0x30] sm:$0xff]  ;;  %v1415_v26 = vld [vmem:[%s5603_s3 + $0x48] sm:$0xff] }
 0x205   :  { %v3252_v31 = vmul.f32 -1.442695, %v3942_v18  ;;  %v3263_v18 = vld [vmem:[%s5604_s0 + $0x6] sm:$0x3]  ;;  %v4766_v22 = vpack.c.bf16 %v1412_v17, %v1408_v13  ;;  %v4905_v17 = vpack.c.bf16 %v1442_v60, %v1438_v59  ;;  %v1469_v59 = vld [vmem:[%s5603_s3 + $0x1f8] sm:$0xff]  ;;  %v4998_v60 = vpack.c.bf16 %v1460_v33, %v1456_v32 }
 0x206   :  { %v3253_v35 = vmul.f32 -1.442695, %v3943_v27  ;;  %v3254_v40 = vmul.f32 -1.442695, %v3945_v39  ;;  %v1419_v27 = vld [vmem:[%s5603_s3 + $0x68] sm:$0xff]  ;;  %v1421_v39 = vld [vmem:[%s5603_s3 + $0x78] sm:$0xff] }
 0x207   :  { %4019 = vpow2.f32 %v3252_v31  ;;  %v1417_v31 = vld [vmem:[%s5603_s3 + $0x58] sm:$0xff] }
 0x208   :  { %4021 = vpow2.f32 %v3253_v35  ;;  %v4781_v35 = vpack.c.bf16 %v1419_v27, %v1415_v26  ;;  %v1444_v26 = vld [vmem:[%s5603_s3 + $0x130] sm:$0xff] }
 0x209   :  { %4023 = vpow2.f32 %v3254_v40  ;;  %v1414_v40 = vld [vmem:[%s5603_s3 + $0x40] sm:$0xff] }
 0x20a   :  { %4025 = vtanh.f32 %v3944_v44  ;;  %v1418_v44 = vld [vmem:[%s5603_s3 + $0x60] sm:$0xff] }
 0x211   :  { %v4020_v51 = vpop.eup %4019 }
 0x212   :  { %v4022_v53 = vpop.eup %4021  ;;  %v821_v54 = vadd.f32 1.0, %v4020_v51  ;;  %v4793_v51 = vpack.c.bf16 %v1421_v39, %v1417_v31  ;;  %v1447_v31 = vld [vmem:[%s5603_s3 + $0x148] sm:$0xff] }
 0x213   :  { %v827_v58 = vadd.f32 1.0, %v4022_v53  ;;  %v4024_v0 = vpop.eup %4023  ;;  %v4795_v53 = vpack.c.bf16 %v1418_v44, %v1414_v40  ;;  %v1451_v39 = vld [vmem:[%s5603_s3 + $0x168] sm:$0xff]  ;;  %v1449_v40 = vld [vmem:[%s5603_s3 + $0x158] sm:$0xff] }
 0x214   :  { %4027 = vrcp.f32 %v821_v54  ;;  %v4026_v1 = vpop.eup %4025  ;;  %v834_v20 = vadd.f32 1.0, %v4024_v0  ;;  %v1416_v54 = vld [vmem:[%s5603_s3 + $0x50] sm:$0xff]  ;;  %v4926_v44 = vpack.c.bf16 %v1451_v39, %v1447_v31  ;;  %v1466_v31 = vld [vmem:[%s5603_s3 + $0x1e0] sm:$0xff] }
 0x215   :  { %4029 = vrcp.f32 %v827_v58  ;;  %v1420_v58 = vld [vmem:[%s5603_s3 + $0x70] sm:$0xff] }
 0x216   :  { %4031 = vrcp.f32 %v834_v20  ;;  %v4805_v0 = vpack.c.bf16 %v1420_v58, %v1416_v54  ;;  %v1429_v20 = vld [vmem:[%s5603_s3 + $0xb8] sm:$0xff]  ;;  %v1446_v58 = vld [vmem:[%s5603_s3 + $0x140] sm:$0xff] }
 0x217   :  { %v1453_v54 = vld [vmem:[%s5603_s3 + $0x178] sm:$0xff] }
 0x21e   :  { %v4028_v2 = vpop.eup %4027 }
 0x21f   :  { %v4030_v10 = vpop.eup %4029  ;;  %v838_v19 = vmul.f32 %v4028_v2, %v4026_v1  ;;  %v1423_v1 = vld [vmem:[%s5603_s3 + $0x88] sm:$0xff] }
 0x220   :  { %v837_v21 = vmul.f32 %v4030_v10, %v4594_v8  ;;  %v4032_v36 = vpop.eup %4031  ;;  %v1413_v8 = vld [vmem:[%s5603_s3 + $0x38] sm:$0xff]  ;;  %v1427_v2 = vld [vmem:[%s5603_s3 + $0xa8] sm:$0xff] }
 0x221   :  { %v4752_v62 = vpack.c.bf16 %v1413_v8, %v1409_v4  ;;  %v1425_v10 = vld [vmem:[%s5603_s3 + $0x98] sm:$0xff]  ;;  %v4891_v4 = vpack.c.bf16 %v1443_v50, %v1439_v49  ;;  %v1463_v49 = vld [vmem:[%s5603_s3 + $0x1c8] sm:$0xff] }
 0x222   :  { %v4652_v28 = vadd.f32 %v838_v19, %v837_v21  ;;  %v4819_v19 = vpack.c.bf16 %v1427_v2, %v1423_v1  ;;  %v1422_v21 = vld [vmem:[%s5603_s3 + $0x80] sm:$0xff]  ;;  %v1445_v8 = vld [vmem:[%s5603_s3 + $0x138] sm:$0xff]  ;;  %v4938_v2 = vpack.c.bf16 %v1453_v54, %v1449_v40  ;;  %v1467_v50 = vld [vmem:[%s5603_s3 + $0x1e8] sm:$0xff] }
 0x223   :  { %v4903_v13 = vpack.c.bf16 %v1445_v8, %v1441_v57  ;;  %v1450_v1 = vld [vmem:[%s5603_s3 + $0x160] sm:$0xff]  ;;  %v4988_v57 = vpack.c.bf16 %v1458_v7, %v1454_v6  ;;  %v1465_v8 = vld [vmem:[%s5603_s3 + $0x1d8] sm:$0xff]  ;;  %v1464_v40 = vld [vmem:[%s5603_s3 + $0x1d0] sm:$0xff] }
 0x224   :  { %4033 = vtanh.f32 %v4652_v28  ;;  %v5009_v39 = vpack.c.bf16 %v1469_v59, %v1465_v8  ;;  %v1468_v54 = vld [vmem:[%s5603_s3 + $0x1f0] sm:$0xff] }
 0x22e   :  { %v4034_v37 = vpop.eup %4033 }
 0x22f   :  { %v841_v38 = vmul.f32 %v4034_v37, %v4032_v36  ;;  %v1426_v36 = vld [vmem:[%s5603_s3 + $0xa0] sm:$0xff]  ;;  %v4831_v37 = vpack.c.bf16 %v1429_v20, %v1425_v10  ;;  %v4940_v10 = vpack.c.bf16 %v1450_v1, %v1446_v58  ;;  %v1448_v20 = vld [vmem:[%s5603_s3 + $0x150] sm:$0xff]  ;;  %v5022_v1 = vpack.c.bf16 %v1468_v54, %v1464_v40 }
 0x231   :  { %3255 = vst [vmem:[%s5606_s4 + $0x2] sm:$0x3] %v841_v38  ;;  %1136 = vmatmul.mubr.f32.vlgmr.msra.gmra.mrb[4].mxu0 %v841_v38  ;;  %1207 = vmatmul.mubr.f32.vlgmr.msra.gmra.mrb[4].mxu1 %v841_v38  ;;  %v4833_v38 = vpack.c.bf16 %v1426_v36, %v1422_v21  ;;  %v1452_v21 = vld [vmem:[%s5603_s3 + $0x170] sm:$0xff]  ;;  %v1455_v36 = vld [vmem:[%s5603_s3 + $0x188] sm:$0xff] }
 0x232   :  { %1328 = vmatprep.mubr.f32.mxu0 %v4131_v3  ;;  %1399 = vmatprep.mubr.f32.mxu1 %v4131_v3  ;;  %v4953_v45 = vpack.c.bf16 %v1452_v21, %v1448_v20  ;;  %v4965_v12 = vpack.c.bf16 %v1459_v52, %v1455_v36 }
 0x233   :  { %3541 = vmatpush1.bf16.msra.mxu0 %v4682_v23  ;;  %3549 = vmatpush1.bf16.msra.mxu1 %v4691_v63 }
 0x234   :  { %3543 = vmatprep.subr.bf16.mxu0 %v4705_v24  ;;  %3551 = vmatprep.subr.bf16.mxu1 %v4716_v34 }
 0x237   :  { %3545 = vmatpush1.bf16.msra.mxu0 %v4718_v42  ;;  %3553 = vmatpush1.bf16.msra.mxu1 %v4727_v41 }
 0x238   :  { %3555 = vmatprep.subr.bf16.mxu0 %v4741_v43  ;;  %3587 = vmatprep.subr.bf16.mxu1 %v4752_v62 }
 0x23a   :  { %3264 = vmatmul.mubr.msk.f32.vlgmr.msra.gmra.mrb[6].mxu0 %vm64_vm0, %v3263_v18  ;;  %3265 = vmatmul.mubr.msk.f32.vlgmr.msra.gmra.mrb[6].mxu1 %vm64_vm0, %v3263_v18  ;;  %v1440_v18 = vld [vmem:[%s5603_s3 + $0x110] sm:$0xff] }
 0x23b   :  { %3557 = vmatpush1.bf16.msra.mxu0 %v4754_v9  ;;  %3589 = vmatpush1.bf16.msra.mxu1 %v4766_v22  ;;  %v4914_v27 = vpack.c.bf16 %v1444_v26, %v1440_v18  ;;  %v5000_v18 = vpack.c.bf16 %v1467_v50, %v1463_v49  ;;  %v1462_v26 = vld [vmem:[%s5603_s3 + $0x1c0] sm:$0xff] }
 0x23c   :  { %1534 = vmatprep.mubr.f32.mxu0 %v4131_v3  ;;  %3559 = vmatprep.subr.bf16.mxu0 %v4781_v35  ;;  %v5018_v58 = vpack.c.bf16 %v1466_v31, %v1462_v26 }
 0x23d   :  { %1605 = vmatprep.mubr.f32.mxu1 %v4131_v3  ;;  %3591 = vmatprep.subr.bf16.mxu1 %v4793_v51 }
 0x23f   :  { %3561 = vmatpush1.bf16.msra.mxu0 %v4795_v53  ;;  %3593 = vmatpush1.bf16.msra.mxu1 %v4805_v0 }
 0x240   :  { %3563 = vmatprep.subr.bf16.mxu0 %v4819_v19  ;;  %3595 = vmatprep.subr.bf16.mxu1 %v4831_v37 }
 0x243   :  { %3565 = vmatpush1.bf16.msra.mxu0 %v4833_v38  ;;  %3597 = vmatpush1.bf16.msra.mxu1 %v4842_v55 }
 0x244   :  { %3567 = vmatprep.subr.bf16.mxu0 %v4855_v29  ;;  %3599 = vmatprep.subr.bf16.mxu1 %v4867_v16 }
 0x247   :  { %3569 = vmatpush1.bf16.msra.mxu0 %v4869_v25  ;;  %3601 = vmatpush1.bf16.msra.mxu1 %v4878_v46 }
 0x248   :  { %3571 = vmatprep.subr.bf16.mxu0 %v4891_v4  ;;  %3603 = vmatprep.subr.bf16.mxu1 %v4903_v13 }
 0x24b   :  { %3573 = vmatpush1.bf16.msra.mxu0 %v4905_v17  ;;  %3605 = vmatpush1.bf16.msra.mxu1 %v4914_v27 }
 0x24c   :  { %3575 = vmatprep.subr.bf16.mxu0 %v4926_v44  ;;  %3607 = vmatprep.subr.bf16.mxu1 %v4938_v2 }
 0x24f   :  { %3577 = vmatpush1.bf16.msra.mxu0 %v4940_v10  ;;  %3609 = vmatpush1.bf16.msra.mxu1 %v4953_v45 }
 0x250   :  { %3579 = vmatprep.subr.bf16.mxu0 %v4965_v12  ;;  %3611 = vmatprep.subr.bf16.mxu1 %v4967_v30 }
 0x253   :  { %3581 = vmatpush1.bf16.msra.mxu0 %v4988_v57  ;;  %3613 = vmatpush1.bf16.msra.mxu1 %v4998_v60 }
 0x254   :  { %3583 = vmatprep.subr.bf16.mxu0 %v5000_v18  ;;  %3615 = vmatprep.subr.bf16.mxu1 %v5009_v39 }
 0x257   :  { %3585 = vmatpush1.bf16.msra.mxu0 %v5018_v58  ;;  %3617 = vmatpush1.bf16.msra.mxu1 %v5022_v1 }
 0x258   :  { %3619 = vmatprep.subr.bf16.mxu0 %v4669_v56  ;;  %3627 = vmatprep.subr.bf16.mxu1 %v4680_v14 }
 0x304   :  { %v1137_v20 = vpop.f32.mrb[4].mxu0  ;;  %v1208_v21 = vpop.f32.mrb[4].mxu1 }
 0x305   :  { %v3946_v36 = vadd.f32 %v1137_v20, %v4582_v47  ;;  %v1139_v52 = vpop.f32.mrb[5].mxu0  ;;  %v1210_v61 = vpop.f32.mrb[5].mxu1  ;;  %v3948_v49 = vadd.f32 %v1208_v21, %v4591_v15 }
 0x306   :  { %v3947_v11 = vadd.f32 %v1139_v52, %v4584_v48  ;;  %v3949_v32 = vadd.f32 %v1210_v61, %v4588_v5 }
 0x307   :  { %v3259_v6 = vmul.f32 -1.442695, %v3946_v36 }
 0x308   :  { %v3260_v7 = vmul.f32 -1.442695, %v3947_v11  ;;  %v3261_v33 = vmul.f32 -1.442695, %v3949_v32 }
 0x309   :  { %4035 = vpow2.f32 %v3259_v6 }
 0x30a   :  { %4037 = vpow2.f32 %v3260_v7 }
 0x30b   :  { %4039 = vpow2.f32 %v3261_v33 }
 0x30c   :  { %4041 = vtanh.f32 %v3948_v49 }
 0x313   :  { %v4036_v50 = vpop.eup %4035 }
 0x314   :  { %v4038_v8 = vpop.eup %4037  ;;  %v1220_v59 = vadd.f32 1.0, %v4036_v50 }
 0x315   :  { %v1226_v26 = vadd.f32 1.0, %v4038_v8  ;;  %v4040_v31 = vpop.eup %4039 }
 0x316   :  { %4043 = vrcp.f32 %v1220_v59  ;;  %v4042_v40 = vpop.eup %4041  ;;  %v1233_v52 = vadd.f32 1.0, %v4040_v31 }
 0x317   :  { %4045 = vrcp.f32 %v1226_v26 }
 0x318   :  { %4047 = vrcp.f32 %v1233_v52 }
 0x320   :  { %v4044_v54 = vpop.eup %4043 }
 0x321   :  { %v4046_v20 = vpop.eup %4045  ;;  %v1237_v36 = vmul.f32 %v4044_v54, %v4042_v40 }
 0x322   :  { %v1236_v11 = vmul.f32 %v4046_v20, %v4652_v28  ;;  %v4048_v21 = vpop.eup %4047  ;;  %v3270_v28 = vld [vmem:[%s5604_s0 + $0x8] sm:$0x3] }
 0x324   :  { %v5034_v61 = vadd.f32 %v1237_v36, %v1236_v11 }
 0x326   :  { %4049 = vtanh.f32 %v5034_v61 }
 0x330   :  { %v4050_v6 = vpop.eup %4049 }
 0x331   :  { %v1240_v7 = vmul.f32 %v4050_v6, %v4048_v21 }
 0x333   :  { %3262 = vst [vmem:[%s5606_s4 + $0x4] sm:$0x3] %v1240_v7  ;;  %1535 = vmatmul.mubr.f32.vlgmr.msra.gmra.mrb[6].mxu0 %v1240_v7  ;;  %1606 = vmatmul.mubr.f32.vlgmr.msra.gmra.mrb[6].mxu1 %v1240_v7 }
 0x334   :  { %3621 = vmatpush1.bf16.msra.mxu0 %v4682_v23  ;;  %3629 = vmatpush1.bf16.msra.mxu1 %v4691_v63 }
 0x335   :  { %3623 = vmatprep.subr.bf16.mxu0 %v4705_v24  ;;  %3631 = vmatprep.subr.bf16.mxu1 %v4716_v34 }
 0x336   :  { %1727 = vmatprep.mubr.f32.mxu0 %v4131_v3  ;;  %1798 = vmatprep.mubr.f32.mxu1 %v4131_v3 }
 0x338   :  { %3625 = vmatpush1.bf16.msra.mxu0 %v4718_v42  ;;  %3633 = vmatpush1.bf16.msra.mxu1 %v4727_v41 }
 0x339   :  { %3635 = vmatprep.subr.bf16.mxu0 %v4741_v43  ;;  %3667 = vmatprep.subr.bf16.mxu1 %v4752_v62 }
 0x33b   :  { %3271 = vmatmul.mubr.msk.f32.vlgmr.msra.gmra.mrb[8].mxu0 %vm64_vm0, %v3270_v28  ;;  %3272 = vmatmul.mubr.msk.f32.vlgmr.msra.gmra.mrb[8].mxu1 %vm64_vm0, %v3270_v28 }
 0x33c   :  { %3637 = vmatpush1.bf16.msra.mxu0 %v4754_v9  ;;  %3669 = vmatpush1.bf16.msra.mxu1 %v4766_v22 }
 0x33d   :  { %3639 = vmatprep.subr.bf16.mxu0 %v4781_v35  ;;  %3671 = vmatprep.subr.bf16.mxu1 %v4793_v51 }
 0x33e   :  { %1933 = vmatprep.mubr.f32.mxu0 %v4131_v3  ;;  %2004 = vmatprep.mubr.f32.mxu1 %v4131_v3 }
 0x340   :  { %3641 = vmatpush1.bf16.msra.mxu0 %v4795_v53  ;;  %3673 = vmatpush1.bf16.msra.mxu1 %v4805_v0 }
 0x341   :  { %3643 = vmatprep.subr.bf16.mxu0 %v4819_v19  ;;  %3675 = vmatprep.subr.bf16.mxu1 %v4831_v37 }
 0x344   :  { %3645 = vmatpush1.bf16.msra.mxu0 %v4833_v38  ;;  %3677 = vmatpush1.bf16.msra.mxu1 %v4842_v55 }
 0x345   :  { %3647 = vmatprep.subr.bf16.mxu0 %v4855_v29  ;;  %3679 = vmatprep.subr.bf16.mxu1 %v4867_v16 }
 0x348   :  { %3649 = vmatpush1.bf16.msra.mxu0 %v4869_v25  ;;  %3681 = vmatpush1.bf16.msra.mxu1 %v4878_v46 }
 0x349   :  { %3651 = vmatprep.subr.bf16.mxu0 %v4891_v4  ;;  %3683 = vmatprep.subr.bf16.mxu1 %v4903_v13 }
 0x34c   :  { %3653 = vmatpush1.bf16.msra.mxu0 %v4905_v17  ;;  %3685 = vmatpush1.bf16.msra.mxu1 %v4914_v27 }
 0x34d   :  { %3655 = vmatprep.subr.bf16.mxu0 %v4926_v44  ;;  %3687 = vmatprep.subr.bf16.mxu1 %v4938_v2 }
 0x350   :  { %3657 = vmatpush1.bf16.msra.mxu0 %v4940_v10  ;;  %3689 = vmatpush1.bf16.msra.mxu1 %v4953_v45 }
 0x351   :  { %3659 = vmatprep.subr.bf16.mxu0 %v4965_v12  ;;  %3691 = vmatprep.subr.bf16.mxu1 %v4967_v30 }
 0x354   :  { %3661 = vmatpush1.bf16.msra.mxu0 %v4988_v57  ;;  %3693 = vmatpush1.bf16.msra.mxu1 %v4998_v60 }
 0x355   :  { %3663 = vmatprep.subr.bf16.mxu0 %v5000_v18  ;;  %3695 = vmatprep.subr.bf16.mxu1 %v5009_v39 }
 0x358   :  { %3665 = vmatpush1.bf16.msra.mxu0 %v5018_v58  ;;  %3697 = vmatpush1.bf16.msra.mxu1 %v5022_v1 }
 0x359   :  { %3699 = vmatprep.subr.bf16.mxu0 %v4669_v56  ;;  %3707 = vmatprep.subr.bf16.mxu1 %v4680_v14 }
 0x406   :  { %v1536_v32 = vpop.f32.mrb[6].mxu0  ;;  %v1607_v33 = vpop.f32.mrb[6].mxu1 }
 0x407   :  { %v3950_v49 = vadd.f32 %v1536_v32, %v4582_v47  ;;  %v1538_v50 = vpop.f32.mrb[7].mxu0  ;;  %v1609_v8 = vpop.f32.mrb[7].mxu1  ;;  %v3952_v20 = vadd.f32 %v1607_v33, %v4591_v15 }
 0x408   :  { %v3951_v59 = vadd.f32 %v1538_v50, %v4584_v48  ;;  %v3953_v40 = vadd.f32 %v1609_v8, %v4588_v5 }
 0x409   :  { %v3266_v26 = vmul.f32 -1.442695, %v3950_v49 }
 0x40a   :  { %v3267_v31 = vmul.f32 -1.442695, %v3951_v59  ;;  %v3268_v54 = vmul.f32 -1.442695, %v3953_v40  ;;  %v2453_v40 = vld [vmem:[%s5602_s1 + $0x58] sm:$0xff] }
 0x40b   :  { %4051 = vpow2.f32 %v3266_v26  ;;  %v2451_v26 = vld [vmem:[%s5602_s1 + $0x48] sm:$0xff] }
 0x40c   :  { %4053 = vpow2.f32 %v3267_v31  ;;  %v2455_v31 = vld [vmem:[%s5602_s1 + $0x68] sm:$0xff] }
 0x40d   :  { %4055 = vpow2.f32 %v3268_v54  ;;  %v5205_v54 = vpack.c.bf16 %v2455_v31, %v2451_v26  ;;  %v2627_v26 = vld [vmem:[%s5603_s3 + $0xc0] sm:$0xff] }
 0x40e   :  { %4057 = vtanh.f32 %v3952_v20  ;;  %v2457_v20 = vld [vmem:[%s5602_s1 + $0x78] sm:$0xff]  ;;  %v2631_v31 = vld [vmem:[%s5603_s3 + $0xe0] sm:$0xff] }
 0x415   :  { %v4052_v56 = vpop.eup %4051 }
 0x416   :  { %v4054_v36 = vpop.eup %4053  ;;  %v1619_v14 = vadd.f32 1.0, %v4052_v56  ;;  %v2450_v56 = vld [vmem:[%s5602_s1 + $0x40] sm:$0xff] }
 0x417   :  { %v1625_v52 = vadd.f32 1.0, %v4054_v36  ;;  %v4056_v11 = vpop.eup %4055  ;;  %v2454_v36 = vld [vmem:[%s5602_s1 + $0x60] sm:$0xff] }
 0x418   :  { %4059 = vrcp.f32 %v1619_v14  ;;  %v4058_v21 = vpop.eup %4057  ;;  %v1632_v32 = vadd.f32 1.0, %v4056_v11  ;;  %v5216_v14 = vpack.c.bf16 %v2457_v20, %v2453_v40  ;;  %v2452_v11 = vld [vmem:[%s5602_s1 + $0x50] sm:$0xff]  ;;  %v5369_v20 = vpack.c.bf16 %v2631_v31, %v2627_v26  ;;  %v2651_v26 = vld [vmem:[%s5603_s3 + $0x180] sm:$0xff] }
 0x419   :  { %4061 = vrcp.f32 %v1625_v52  ;;  %v5218_v52 = vpack.c.bf16 %v2454_v36, %v2450_v56  ;;  %v2629_v56 = vld [vmem:[%s5603_s3 + $0xd0] sm:$0xff]  ;;  %v2655_v31 = vld [vmem:[%s5603_s3 + $0x1a0] sm:$0xff] }
 0x41a   :  { %4063 = vrcp.f32 %v1632_v32  ;;  %v2606_v32 = vld [vmem:[%s5603_s3 + $0x18] sm:$0xff]  ;;  %v2633_v36 = vld [vmem:[%s5603_s3 + $0xf0] sm:$0xff] }
 0x422   :  { %v4060_v6 = vpop.eup %4059 }
 0x423   :  { %v4062_v7 = vpop.eup %4061  ;;  %v1636_v28 = vmul.f32 %v4060_v6, %v4058_v21  ;;  %v2456_v21 = vld [vmem:[%s5602_s1 + $0x70] sm:$0xff] }
 0x424   :  { %v1635_v49 = vmul.f32 %v4062_v7, %v5034_v61  ;;  %v4064_v33 = vpop.eup %4063  ;;  %v5227_v6 = vpack.c.bf16 %v2456_v21, %v2452_v11  ;;  %v2604_v7 = vld [vmem:[%s5603_s3 + $0x8] sm:$0xff]  ;;  %v5378_v11 = vpack.c.bf16 %v2633_v36, %v2629_v56  ;;  %v2653_v56 = vld [vmem:[%s5603_s3 + $0x190] sm:$0xff] }
 0x425   :  { %v2636_v21 = vld [vmem:[%s5603_s3 + $0x108] sm:$0xff]  ;;  %v2657_v36 = vld [vmem:[%s5603_s3 + $0x1b0] sm:$0xff] }
 0x426   :  { %v5094_v50 = vadd.f32 %v1636_v28, %v1635_v49  ;;  %v2608_v28 = vld [vmem:[%s5603_s3 + $0x28] sm:$0xff] }
 0x427   :  { %v5241_v49 = vpack.c.bf16 %v2608_v28, %v2604_v7  ;;  %v2640_v7 = vld [vmem:[%s5603_s3 + $0x128] sm:$0xff]  ;;  %v2638_v28 = vld [vmem:[%s5603_s3 + $0x118] sm:$0xff] }
 0x428   :  { %4065 = vtanh.f32 %v5094_v50 }
 0x432   :  { %v4066_v8 = vpop.eup %4065 }
 0x433   :  { %v1639_v59 = vmul.f32 %v4066_v8, %v4064_v33  ;;  %v2603_v33 = vld [vmem:[%s5603_s3] sm:$0xff] }
 0x434   :  { %v2607_v8 = vld [vmem:[%s5603_s3 + $0x20] sm:$0xff] }
 0x435   :  { %3269 = vst [vmem:[%s5606_s4 + $0x6] sm:$0x3] %v1639_v59  ;;  %1934 = vmatmul.mubr.f32.vlgmr.msra.gmra.mrb[8].mxu0 %v1639_v59  ;;  %2005 = vmatmul.mubr.f32.vlgmr.msra.gmra.mrb[8].mxu1 %v1639_v59 }
 0x436   :  { %3701 = vmatpush1.bf16.msra.mxu0 %v4682_v23  ;;  %3709 = vmatpush1.bf16.msra.mxu1 %v4691_v63  ;;  %v3277_v23 = vld [vmem:[%s5604_s0 + $0xa] sm:$0x3] }
 0x437   :  { %3703 = vmatprep.subr.bf16.mxu0 %v4705_v24  ;;  %3711 = vmatprep.subr.bf16.mxu1 %v4716_v34 }
 0x438   :  { %2126 = vmatprep.mubr.f32.mxu0 %v4131_v3  ;;  %2197 = vmatprep.mubr.f32.mxu1 %v4131_v3 }
 0x43a   :  { %3705 = vmatpush1.bf16.msra.mxu0 %v4718_v42  ;;  %3713 = vmatpush1.bf16.msra.mxu1 %v4727_v41 }
 0x43b   :  { %3715 = vmatprep.subr.bf16.mxu0 %v4741_v43  ;;  %3747 = vmatprep.subr.bf16.mxu1 %v4752_v62 }
 0x43d   :  { %3278 = vmatmul.mubr.msk.f32.vlgmr.msra.gmra.mrb[10].mxu0 %vm64_vm0, %v3277_v23  ;;  %3279 = vmatmul.mubr.msk.f32.vlgmr.msra.gmra.mrb[10].mxu1 %vm64_vm0, %v3277_v23  ;;  %v5254_v23 = vpack.c.bf16 %v2607_v8, %v2603_v33  ;;  %v2635_v33 = vld [vmem:[%s5603_s3 + $0x100] sm:$0xff] }
 0x43e   :  { %3717 = vmatpush1.bf16.msra.mxu0 %v4754_v9  ;;  %3749 = vmatpush1.bf16.msra.mxu1 %v4766_v22  ;;  %v2639_v8 = vld [vmem:[%s5603_s3 + $0x120] sm:$0xff] }
 0x43f   :  { %3719 = vmatprep.subr.bf16.mxu0 %v4781_v35  ;;  %3751 = vmatprep.subr.bf16.mxu1 %v4793_v51 }
 0x440   :  { %2332 = vmatprep.mubr.f32.mxu0 %v4131_v3  ;;  %2403 = vmatprep.mubr.f32.mxu1 %v4131_v3 }
 0x442   :  { %3721 = vmatpush1.bf16.msra.mxu0 %v4795_v53  ;;  %3753 = vmatpush1.bf16.msra.mxu1 %v4805_v0 }
 0x443   :  { %3723 = vmatprep.subr.bf16.mxu0 %v4819_v19  ;;  %3755 = vmatprep.subr.bf16.mxu1 %v4831_v37 }
 0x446   :  { %3725 = vmatpush1.bf16.msra.mxu0 %v4833_v38  ;;  %3757 = vmatpush1.bf16.msra.mxu1 %v4842_v55 }
 0x447   :  { %3727 = vmatprep.subr.bf16.mxu0 %v4855_v29  ;;  %3759 = vmatprep.subr.bf16.mxu1 %v4867_v16 }
 0x44a   :  { %3729 = vmatpush1.bf16.msra.mxu0 %v4869_v25  ;;  %3761 = vmatpush1.bf16.msra.mxu1 %v4878_v46 }
 0x44b   :  { %3731 = vmatprep.subr.bf16.mxu0 %v4891_v4  ;;  %3763 = vmatprep.subr.bf16.mxu1 %v4903_v13 }
 0x44e   :  { %3733 = vmatpush1.bf16.msra.mxu0 %v4905_v17  ;;  %3765 = vmatpush1.bf16.msra.mxu1 %v4914_v27 }
 0x44f   :  { %3735 = vmatprep.subr.bf16.mxu0 %v4926_v44  ;;  %3767 = vmatprep.subr.bf16.mxu1 %v4938_v2  ;;  %v2443_v2 = vld [vmem:[%s5602_s1 + $0x8] sm:$0xff] }
 0x452   :  { %3737 = vmatpush1.bf16.msra.mxu0 %v4940_v10  ;;  %3769 = vmatpush1.bf16.msra.mxu1 %v4953_v45  ;;  %v2447_v10 = vld [vmem:[%s5602_s1 + $0x28] sm:$0xff]  ;;  %v2445_v45 = vld [vmem:[%s5602_s1 + $0x18] sm:$0xff] }
 0x453   :  { %3739 = vmatprep.subr.bf16.mxu0 %v4965_v12  ;;  %3771 = vmatprep.subr.bf16.mxu1 %v4967_v30  ;;  %v5169_v12 = vpack.c.bf16 %v2447_v10, %v2443_v2  ;;  %v2449_v30 = vld [vmem:[%s5602_s1 + $0x38] sm:$0xff]  ;;  %v2621_v2 = vld [vmem:[%s5603_s3 + $0x90] sm:$0xff] }
 0x454   :  { %v2625_v10 = vld [vmem:[%s5603_s3 + $0xb0] sm:$0xff] }
 0x456   :  { %3741 = vmatpush1.bf16.msra.mxu0 %v4988_v57  ;;  %3773 = vmatpush1.bf16.msra.mxu1 %v4998_v60  ;;  %v2442_v57 = vld [vmem:[%s5602_s1] sm:$0xff] }
 0x457   :  { %3743 = vmatprep.subr.bf16.mxu0 %v5000_v18  ;;  %3775 = vmatprep.subr.bf16.mxu1 %v5009_v39  ;;  %v2446_v60 = vld [vmem:[%s5602_s1 + $0x20] sm:$0xff]  ;;  %v5180_v18 = vpack.c.bf16 %v2449_v30, %v2445_v45  ;;  %v5342_v45 = vpack.c.bf16 %v2625_v10, %v2621_v2  ;;  %v2628_v30 = vld [vmem:[%s5603_s3 + $0xc8] sm:$0xff] }
 0x458   :  { %v5182_v39 = vpack.c.bf16 %v2446_v60, %v2442_v57  ;;  %v2632_v57 = vld [vmem:[%s5603_s3 + $0xe8] sm:$0xff]  ;;  %v2630_v60 = vld [vmem:[%s5603_s3 + $0xd8] sm:$0xff] }
 0x459   :  { %v2656_v10 = vld [vmem:[%s5603_s3 + $0x1a8] sm:$0xff] }
 0x45a   :  { %3745 = vmatpush1.bf16.msra.mxu0 %v5018_v58  ;;  %3777 = vmatpush1.bf16.msra.mxu1 %v5022_v1  ;;  %v2444_v58 = vld [vmem:[%s5602_s1 + $0x10] sm:$0xff] }
 0x45b   :  { %v2448_v1 = vld [vmem:[%s5602_s1 + $0x30] sm:$0xff]  ;;  %3779 = vmatprep.subr.bf16.mxu0 %v5169_v12  ;;  %3787 = vmatprep.subr.bf16.mxu1 %v5180_v18 }
 0x45c   :  { %v5191_v61 = vpack.c.bf16 %v2448_v1, %v2444_v58  ;;  %v5355_v58 = vpack.c.bf16 %v2632_v57, %v2628_v30  ;;  %v2634_v1 = vld [vmem:[%s5603_s3 + $0xf8] sm:$0xff] }
 0x45d   :  { %v5367_v40 = vpack.c.bf16 %v2634_v1, %v2630_v60  ;;  %v2654_v30 = vld [vmem:[%s5603_s3 + $0x198] sm:$0xff] }
 0x45e   :  { %v2658_v57 = vld [vmem:[%s5603_s3 + $0x1b8] sm:$0xff] }
 0x45f   :  { %v5467_v1 = vpack.c.bf16 %v2658_v57, %v2654_v30 }
 0x508   :  { %v1935_v63 = vpop.f32.mrb[8].mxu0  ;;  %v2006_v24 = vpop.f32.mrb[8].mxu1 }
 0x509   :  { %v3954_v34 = vadd.f32 %v1935_v63, %v4582_v47  ;;  %v1937_v42 = vpop.f32.mrb[9].mxu0  ;;  %v2008_v41 = vpop.f32.mrb[9].mxu1  ;;  %v3956_v51 = vadd.f32 %v2006_v24, %v4591_v15  ;;  %v2605_v63 = vld [vmem:[%s5603_s3 + $0x10] sm:$0xff] }
 0x50a   :  { %v3955_v43 = vadd.f32 %v1937_v42, %v4584_v48  ;;  %v3957_v22 = vadd.f32 %v2008_v41, %v4588_v5  ;;  %v2609_v24 = vld [vmem:[%s5603_s3 + $0x30] sm:$0xff]  ;;  %v2612_v41 = vld [vmem:[%s5603_s3 + $0x48] sm:$0xff] }
 0x50b   :  { %v3273_v62 = vmul.f32 -1.442695, %v3954_v34  ;;  %v3284_v34 = vld [vmem:[%s5604_s0 + $0xc] sm:$0x3]  ;;  %v5266_v42 = vpack.c.bf16 %v2609_v24, %v2605_v63  ;;  %v5405_v24 = vpack.c.bf16 %v2639_v8, %v2635_v33  ;;  %v2666_v33 = vld [vmem:[%s5603_s3 + $0x1f8] sm:$0xff]  ;;  %v5498_v8 = vpack.c.bf16 %v2657_v36, %v2653_v56 }
 0x50c   :  { %v3274_v9 = vmul.f32 -1.442695, %v3955_v43  ;;  %v3275_v35 = vmul.f32 -1.442695, %v3957_v22  ;;  %v2616_v43 = vld [vmem:[%s5603_s3 + $0x68] sm:$0xff]  ;;  %v2618_v22 = vld [vmem:[%s5603_s3 + $0x78] sm:$0xff] }
 0x50d   :  { %4067 = vpow2.f32 %v3273_v62  ;;  %v2614_v62 = vld [vmem:[%s5603_s3 + $0x58] sm:$0xff] }
 0x50e   :  { %4069 = vpow2.f32 %v3274_v9  ;;  %v5281_v9 = vpack.c.bf16 %v2616_v43, %v2612_v41  ;;  %v2641_v41 = vld [vmem:[%s5603_s3 + $0x130] sm:$0xff] }
 0x50f   :  { %4071 = vpow2.f32 %v3275_v35  ;;  %v2611_v35 = vld [vmem:[%s5603_s3 + $0x40] sm:$0xff] }
 0x510   :  { %4073 = vtanh.f32 %v3956_v51  ;;  %v2615_v51 = vld [vmem:[%s5603_s3 + $0x60] sm:$0xff] }
 0x517   :  { %v4068_v53 = vpop.eup %4067 }
 0x518   :  { %v4070_v0 = vpop.eup %4069  ;;  %v2018_v19 = vadd.f32 1.0, %v4068_v53  ;;  %v5293_v53 = vpack.c.bf16 %v2618_v22, %v2614_v62  ;;  %v2644_v62 = vld [vmem:[%s5603_s3 + $0x148] sm:$0xff] }
 0x519   :  { %v2024_v37 = vadd.f32 1.0, %v4070_v0  ;;  %v4072_v38 = vpop.eup %4071  ;;  %v5295_v0 = vpack.c.bf16 %v2615_v51, %v2611_v35  ;;  %v2648_v22 = vld [vmem:[%s5603_s3 + $0x168] sm:$0xff]  ;;  %v2646_v35 = vld [vmem:[%s5603_s3 + $0x158] sm:$0xff] }
 0x51a   :  { %4075 = vrcp.f32 %v2018_v19  ;;  %v4074_v55 = vpop.eup %4073  ;;  %v2031_v46 = vadd.f32 1.0, %v4072_v38  ;;  %v2613_v19 = vld [vmem:[%s5603_s3 + $0x50] sm:$0xff]  ;;  %v5426_v51 = vpack.c.bf16 %v2648_v22, %v2644_v62  ;;  %v2663_v62 = vld [vmem:[%s5603_s3 + $0x1e0] sm:$0xff] }
 0x51b   :  { %4077 = vrcp.f32 %v2024_v37  ;;  %v2617_v37 = vld [vmem:[%s5603_s3 + $0x70] sm:$0xff] }
 0x51c   :  { %4079 = vrcp.f32 %v2031_v46  ;;  %v5305_v38 = vpack.c.bf16 %v2617_v37, %v2613_v19  ;;  %v2626_v46 = vld [vmem:[%s5603_s3 + $0xb8] sm:$0xff]  ;;  %v2643_v37 = vld [vmem:[%s5603_s3 + $0x140] sm:$0xff] }
 0x51d   :  { %v2650_v19 = vld [vmem:[%s5603_s3 + $0x178] sm:$0xff] }
 0x524   :  { %v4076_v29 = vpop.eup %4075 }
 0x525   :  { %v4078_v16 = vpop.eup %4077  ;;  %v2035_v25 = vmul.f32 %v4076_v29, %v4074_v55  ;;  %v2620_v55 = vld [vmem:[%s5603_s3 + $0x88] sm:$0xff] }
 0x526   :  { %v2034_v4 = vmul.f32 %v4078_v16, %v5094_v50  ;;  %v4080_v17 = vpop.eup %4079  ;;  %v2610_v50 = vld [vmem:[%s5603_s3 + $0x38] sm:$0xff]  ;;  %v2624_v29 = vld [vmem:[%s5603_s3 + $0xa8] sm:$0xff] }
 0x527   :  { %v5252_v59 = vpack.c.bf16 %v2610_v50, %v2606_v32  ;;  %v2622_v16 = vld [vmem:[%s5603_s3 + $0x98] sm:$0xff]  ;;  %v5391_v32 = vpack.c.bf16 %v2640_v7, %v2636_v21  ;;  %v2660_v21 = vld [vmem:[%s5603_s3 + $0x1c8] sm:$0xff] }
 0x528   :  { %v5152_v13 = vadd.f32 %v2035_v25, %v2034_v4  ;;  %v5319_v25 = vpack.c.bf16 %v2624_v29, %v2620_v55  ;;  %v2619_v4 = vld [vmem:[%s5603_s3 + $0x80] sm:$0xff]  ;;  %v2642_v50 = vld [vmem:[%s5603_s3 + $0x138] sm:$0xff]  ;;  %v5438_v29 = vpack.c.bf16 %v2650_v19, %v2646_v35  ;;  %v2664_v7 = vld [vmem:[%s5603_s3 + $0x1e8] sm:$0xff] }
 0x529   :  { %v5403_v63 = vpack.c.bf16 %v2642_v50, %v2638_v28  ;;  %v2647_v55 = vld [vmem:[%s5603_s3 + $0x160] sm:$0xff]  ;;  %v5488_v28 = vpack.c.bf16 %v2655_v31, %v2651_v26  ;;  %v2662_v50 = vld [vmem:[%s5603_s3 + $0x1d8] sm:$0xff]  ;;  %v2661_v35 = vld [vmem:[%s5603_s3 + $0x1d0] sm:$0xff] }
 0x52a   :  { %4081 = vtanh.f32 %v5152_v13  ;;  %v5509_v22 = vpack.c.bf16 %v2666_v33, %v2662_v50  ;;  %v2665_v19 = vld [vmem:[%s5603_s3 + $0x1f0] sm:$0xff] }
 0x534   :  { %v4082_v27 = vpop.eup %4081 }
 0x535   :  { %v2038_v44 = vmul.f32 %v4082_v27, %v4080_v17  ;;  %v2623_v17 = vld [vmem:[%s5603_s3 + $0xa0] sm:$0xff]  ;;  %v5331_v27 = vpack.c.bf16 %v2626_v46, %v2622_v16  ;;  %v5440_v16 = vpack.c.bf16 %v2647_v55, %v2643_v37  ;;  %v2645_v46 = vld [vmem:[%s5603_s3 + $0x150] sm:$0xff]  ;;  %v5522_v55 = vpack.c.bf16 %v2665_v19, %v2661_v35 }
 0x537   :  { %3276 = vst [vmem:[%s5606_s4 + $0x8] sm:$0x3] %v2038_v44  ;;  %2333 = vmatmul.mubr.f32.vlgmr.msra.gmra.mrb[10].mxu0 %v2038_v44  ;;  %2404 = vmatmul.mubr.f32.vlgmr.msra.gmra.mrb[10].mxu1 %v2038_v44  ;;  %v5333_v44 = vpack.c.bf16 %v2623_v17, %v2619_v4  ;;  %v2649_v4 = vld [vmem:[%s5603_s3 + $0x170] sm:$0xff]  ;;  %v2652_v17 = vld [vmem:[%s5603_s3 + $0x188] sm:$0xff] }
 0x538   :  { %2525 = vmatprep.mubr.f32.mxu0 %v4131_v3  ;;  %2596 = vmatprep.mubr.f32.mxu1 %v4131_v3  ;;  %v5453_v2 = vpack.c.bf16 %v2649_v4, %v2645_v46  ;;  %v5465_v60 = vpack.c.bf16 %v2656_v10, %v2652_v17 }
 0x539   :  { %3781 = vmatpush1.bf16.msra.mxu0 %v5182_v39  ;;  %3789 = vmatpush1.bf16.msra.mxu1 %v5191_v61 }
 0x53a   :  { %3783 = vmatprep.subr.bf16.mxu0 %v5205_v54  ;;  %3791 = vmatprep.subr.bf16.mxu1 %v5216_v14 }
 0x53d   :  { %3785 = vmatpush1.bf16.msra.mxu0 %v5218_v52  ;;  %3793 = vmatpush1.bf16.msra.mxu1 %v5227_v6 }
 0x53e   :  { %3795 = vmatprep.subr.bf16.mxu0 %v5241_v49  ;;  %3827 = vmatprep.subr.bf16.mxu1 %v5252_v59 }
 0x540   :  { %3285 = vmatmul.mubr.msk.f32.vlgmr.msra.gmra.mrb[12].mxu0 %vm64_vm0, %v3284_v34  ;;  %3286 = vmatmul.mubr.msk.f32.vlgmr.msra.gmra.mrb[12].mxu1 %vm64_vm0, %v3284_v34  ;;  %v2637_v34 = vld [vmem:[%s5603_s3 + $0x110] sm:$0xff] }
 0x541   :  { %3797 = vmatpush1.bf16.msra.mxu0 %v5254_v23  ;;  %3829 = vmatpush1.bf16.msra.mxu1 %v5266_v42  ;;  %v5414_v43 = vpack.c.bf16 %v2641_v41, %v2637_v34  ;;  %v5500_v34 = vpack.c.bf16 %v2664_v7, %v2660_v21  ;;  %v2659_v41 = vld [vmem:[%s5603_s3 + $0x1c0] sm:$0xff] }
 0x542   :  { %2731 = vmatprep.mubr.f32.mxu0 %v4131_v3  ;;  %3799 = vmatprep.subr.bf16.mxu0 %v5281_v9  ;;  %v5518_v37 = vpack.c.bf16 %v2663_v62, %v2659_v41 }
 0x543   :  { %2802 = vmatprep.mubr.f32.mxu1 %v4131_v3  ;;  %3831 = vmatprep.subr.bf16.mxu1 %v5293_v53 }
 0x545   :  { %3801 = vmatpush1.bf16.msra.mxu0 %v5295_v0  ;;  %3833 = vmatpush1.bf16.msra.mxu1 %v5305_v38 }
 0x546   :  { %3803 = vmatprep.subr.bf16.mxu0 %v5319_v25  ;;  %3835 = vmatprep.subr.bf16.mxu1 %v5331_v27 }
 0x549   :  { %3805 = vmatpush1.bf16.msra.mxu0 %v5333_v44  ;;  %3837 = vmatpush1.bf16.msra.mxu1 %v5342_v45 }
 0x54a   :  { %3807 = vmatprep.subr.bf16.mxu0 %v5355_v58  ;;  %3839 = vmatprep.subr.bf16.mxu1 %v5367_v40 }
 0x54d   :  { %3809 = vmatpush1.bf16.msra.mxu0 %v5369_v20  ;;  %3841 = vmatpush1.bf16.msra.mxu1 %v5378_v11 }
 0x54e   :  { %3811 = vmatprep.subr.bf16.mxu0 %v5391_v32  ;;  %3843 = vmatprep.subr.bf16.mxu1 %v5403_v63 }
 0x551   :  { %3813 = vmatpush1.bf16.msra.mxu0 %v5405_v24  ;;  %3845 = vmatpush1.bf16.msra.mxu1 %v5414_v43 }
 0x552   :  { %3815 = vmatprep.subr.bf16.mxu0 %v5426_v51  ;;  %3847 = vmatprep.subr.bf16.mxu1 %v5438_v29 }
 0x555   :  { %3817 = vmatpush1.bf16.msra.mxu0 %v5440_v16  ;;  %3849 = vmatpush1.bf16.msra.mxu1 %v5453_v2 }
 0x556   :  { %3819 = vmatprep.subr.bf16.mxu0 %v5465_v60  ;;  %3851 = vmatprep.subr.bf16.mxu1 %v5467_v1 }
 0x559   :  { %3821 = vmatpush1.bf16.msra.mxu0 %v5488_v28  ;;  %3853 = vmatpush1.bf16.msra.mxu1 %v5498_v8 }
 0x55a   :  { %3823 = vmatprep.subr.bf16.mxu0 %v5500_v34  ;;  %3855 = vmatprep.subr.bf16.mxu1 %v5509_v22 }
 0x55d   :  { %3825 = vmatpush1.bf16.msra.mxu0 %v5518_v37  ;;  %3857 = vmatpush1.bf16.msra.mxu1 %v5522_v55 }
 0x55e   :  { %3859 = vmatprep.subr.bf16.mxu0 %v5169_v12  ;;  %3867 = vmatprep.subr.bf16.mxu1 %v5180_v18 }
 0x60a   :  { %v2334_v46 = vpop.f32.mrb[10].mxu0  ;;  %v2405_v4 = vpop.f32.mrb[10].mxu1 }
 0x60b   :  { %v3958_v17 = vadd.f32 %v2334_v46, %v4582_v47  ;;  %v2336_v10 = vpop.f32.mrb[11].mxu0  ;;  %v2407_v30 = vpop.f32.mrb[11].mxu1  ;;  %v3960_v21 = vadd.f32 %v2405_v4, %v4591_v15 }
 0x60c   :  { %v3959_v57 = vadd.f32 %v2336_v10, %v4584_v48  ;;  %v3961_v56 = vadd.f32 %v2407_v30, %v4588_v5 }
 0x60d   :  { %v3280_v26 = vmul.f32 -1.442695, %v3958_v17 }
 0x60e   :  { %v3281_v31 = vmul.f32 -1.442695, %v3959_v57  ;;  %v3282_v36 = vmul.f32 -1.442695, %v3961_v56 }
 0x60f   :  { %4083 = vpow2.f32 %v3280_v26 }
 0x610   :  { %4085 = vpow2.f32 %v3281_v31 }
 0x611   :  { %4087 = vpow2.f32 %v3282_v36 }
 0x612   :  { %4089 = vtanh.f32 %v3960_v21 }
 0x619   :  { %v4084_v12 = vpop.eup %4083 }
 0x61a   :  { %v4086_v7 = vpop.eup %4085  ;;  %v2417_v18 = vadd.f32 1.0, %v4084_v12 }
 0x61b   :  { %v2423_v50 = vadd.f32 1.0, %v4086_v7  ;;  %v4088_v33 = vpop.eup %4087 }
 0x61c   :  { %4091 = vrcp.f32 %v2417_v18  ;;  %v4090_v41 = vpop.eup %4089  ;;  %v2430_v46 = vadd.f32 1.0, %v4088_v33 }
 0x61d   :  { %4093 = vrcp.f32 %v2423_v50 }
 0x61e   :  { %4095 = vrcp.f32 %v2430_v46 }
 0x626   :  { %v4092_v62 = vpop.eup %4091 }
 0x627   :  { %v4094_v35 = vpop.eup %4093  ;;  %v2434_v19 = vmul.f32 %v4092_v62, %v4090_v41 }
 0x628   :  { %v2433_v17 = vmul.f32 %v4094_v35, %v5152_v13  ;;  %v4096_v4 = vpop.eup %4095  ;;  %v3291_v13 = vld [vmem:[%s5604_s0 + $0xe] sm:$0x3] }
 0x62a   :  { %v5534_v10 = vadd.f32 %v2434_v19, %v2433_v17 }
 0x62c   :  { %4097 = vtanh.f32 %v5534_v10 }
 0x636   :  { %v4098_v30 = vpop.eup %4097 }
 0x637   :  { %v2437_v57 = vmul.f32 %v4098_v30, %v4096_v4 }
 0x639   :  { %3283 = vst [vmem:[%s5606_s4 + $0xa] sm:$0x3] %v2437_v57  ;;  %2732 = vmatmul.mubr.f32.vlgmr.msra.gmra.mrb[12].mxu0 %v2437_v57  ;;  %2803 = vmatmul.mubr.f32.vlgmr.msra.gmra.mrb[12].mxu1 %v2437_v57 }
 0x63a   :  { %3861 = vmatpush1.bf16.msra.mxu0 %v5182_v39  ;;  %3869 = vmatpush1.bf16.msra.mxu1 %v5191_v61 }
 0x63b   :  { %3863 = vmatprep.subr.bf16.mxu0 %v5205_v54  ;;  %3871 = vmatprep.subr.bf16.mxu1 %v5216_v14 }
 0x63c   :  { %2924 = vmatprep.mubr.f32.mxu0 %v4131_v3  ;;  %2995 = vmatprep.mubr.f32.mxu1 %v4131_v3 }
 0x63e   :  { %3865 = vmatpush1.bf16.msra.mxu0 %v5218_v52  ;;  %3873 = vmatpush1.bf16.msra.mxu1 %v5227_v6 }
 0x63f   :  { %3875 = vmatprep.subr.bf16.mxu0 %v5241_v49  ;;  %3907 = vmatprep.subr.bf16.mxu1 %v5252_v59 }
 0x641   :  { %3292 = vmatmul.mubr.msk.f32.vlgmr.msra.gmra.mrb[14].mxu0 %vm64_vm0, %v3291_v13  ;;  %3293 = vmatmul.mubr.msk.f32.vlgmr.msra.gmra.mrb[14].mxu1 %vm64_vm0, %v3291_v13 }
 0x642   :  { %3877 = vmatpush1.bf16.msra.mxu0 %v5254_v23  ;;  %3909 = vmatpush1.bf16.msra.mxu1 %v5266_v42 }
 0x643   :  { %3879 = vmatprep.subr.bf16.mxu0 %v5281_v9  ;;  %3911 = vmatprep.subr.bf16.mxu1 %v5293_v53 }
 0x644   :  { %3130 = vmatprep.mubr.f32.mxu0 %v4131_v3  ;;  %3201 = vmatprep.mubr.f32.mxu1 %v4131_v3 }
 0x646   :  { %3881 = vmatpush1.bf16.msra.mxu0 %v5295_v0  ;;  %3913 = vmatpush1.bf16.msra.mxu1 %v5305_v38 }
 0x647   :  { %3883 = vmatprep.subr.bf16.mxu0 %v5319_v25  ;;  %3915 = vmatprep.subr.bf16.mxu1 %v5331_v27 }
 0x64a   :  { %3885 = vmatpush1.bf16.msra.mxu0 %v5333_v44  ;;  %3917 = vmatpush1.bf16.msra.mxu1 %v5342_v45 }
 0x64b   :  { %3887 = vmatprep.subr.bf16.mxu0 %v5355_v58  ;;  %3919 = vmatprep.subr.bf16.mxu1 %v5367_v40 }
 0x64e   :  { %3889 = vmatpush1.bf16.msra.mxu0 %v5369_v20  ;;  %3921 = vmatpush1.bf16.msra.mxu1 %v5378_v11 }
 0x64f   :  { %3891 = vmatprep.subr.bf16.mxu0 %v5391_v32  ;;  %3923 = vmatprep.subr.bf16.mxu1 %v5403_v63 }
 0x652   :  { %3893 = vmatpush1.bf16.msra.mxu0 %v5405_v24  ;;  %3925 = vmatpush1.bf16.msra.mxu1 %v5414_v43 }
 0x653   :  { %3895 = vmatprep.subr.bf16.mxu0 %v5426_v51  ;;  %3927 = vmatprep.subr.bf16.mxu1 %v5438_v29 }
 0x656   :  { %3897 = vmatpush1.bf16.msra.mxu0 %v5440_v16  ;;  %3929 = vmatpush1.bf16.msra.mxu1 %v5453_v2 }
 0x657   :  { %3899 = vmatprep.subr.bf16.mxu0 %v5465_v60  ;;  %3931 = vmatprep.subr.bf16.mxu1 %v5467_v1 }
 0x65a   :  { %3901 = vmatpush1.bf16.msra.mxu0 %v5488_v28  ;;  %3933 = vmatpush1.bf16.msra.mxu1 %v5498_v8 }
 0x65b   :  { %3903 = vmatprep.subr.bf16.mxu0 %v5500_v34  ;;  %3935 = vmatprep.subr.bf16.mxu1 %v5509_v22 }
 0x65e   :  { %3905 = vmatpush1.bf16.msra.mxu0 %v5518_v37  ;;  %3937 = vmatpush1.bf16.msra.mxu1 %v5522_v55 }
 0x70c   :  { %v2733_v3 = vpop.f32.mrb[12].mxu0  ;;  %v2804_v39 = vpop.f32.mrb[12].mxu1 }
 0x70d   :  { %v3962_v61 = vadd.f32 %v2733_v3, %v4582_v47  ;;  %v2735_v54 = vpop.f32.mrb[13].mxu0  ;;  %v2806_v14 = vpop.f32.mrb[13].mxu1  ;;  %v3964_v42 = vadd.f32 %v2804_v39, %v4591_v15 }
 0x70e   :  { %v3963_v52 = vadd.f32 %v2735_v54, %v4584_v48  ;;  %v3965_v59 = vadd.f32 %v2806_v14, %v4588_v5 }
 0x70f   :  { %v3287_v6 = vmul.f32 -1.442695, %v3962_v61 }
 0x710   :  { %v3288_v49 = vmul.f32 -1.442695, %v3963_v52  ;;  %v3289_v23 = vmul.f32 -1.442695, %v3965_v59 }
 0x711   :  { %4099 = vpow2.f32 %v3287_v6 }
 0x712   :  { %4101 = vpow2.f32 %v3288_v49 }
 0x713   :  { %4103 = vpow2.f32 %v3289_v23 }
 0x714   :  { %4105 = vtanh.f32 %v3964_v42 }
 0x71b   :  { %v4100_v9 = vpop.eup %4099 }
 0x71c   :  { %v4102_v53 = vpop.eup %4101  ;;  %v2816_v0 = vadd.f32 1.0, %v4100_v9 }
 0x71d   :  { %v2822_v38 = vadd.f32 1.0, %v4102_v53  ;;  %v4104_v25 = vpop.eup %4103 }
 0x71e   :  { %4107 = vrcp.f32 %v2816_v0  ;;  %v4106_v27 = vpop.eup %4105  ;;  %v2829_v40 = vadd.f32 1.0, %v4104_v25 }
 0x71f   :  { %4109 = vrcp.f32 %v2822_v38 }
 0x720   :  { %4111 = vrcp.f32 %v2829_v40 }
 0x728   :  { %v4108_v44 = vpop.eup %4107 }
 0x729   :  { %v4110_v45 = vpop.eup %4109  ;;  %v2833_v58 = vmul.f32 %v4108_v44, %v4106_v27 }
 0x72a   :  { %v2832_v20 = vmul.f32 %v4110_v45, %v5534_v10  ;;  %v4112_v32 = vpop.eup %4111 }
 0x72c   :  { %v2834_v11 = vadd.f32 %v2833_v58, %v2832_v20 }
 0x72e   :  { %4113 = vtanh.f32 %v2834_v11 }
 0x738   :  { %v4114_v63 = vpop.eup %4113 }
 0x739   :  { %v2836_v24 = vmul.f32 %v4114_v63, %v4112_v32 }
 0x73b   :  { %3290 = vst [vmem:[%s5606_s4 + $0xc] sm:$0x3] %v2836_v24  ;;  %3131 = vmatmul.mubr.f32.vlgmr.msra.gmra.mrb[14].mxu0 %v2836_v24  ;;  %3202 = vmatmul.mubr.f32.vlgmr.msra.gmra.mrb[14].mxu1 %v2836_v24 }
 0x80e   :  { %v3132_v43 = vpop.f32.mrb[14].mxu0  ;;  %v3203_v51 = vpop.f32.mrb[14].mxu1 }
 0x80f   :  { %v3966_v29 = vadd.f32 %v3132_v43, %v4582_v47  ;;  %v3134_v16 = vpop.f32.mrb[15].mxu0  ;;  %v3205_v2 = vpop.f32.mrb[15].mxu1  ;;  %v3968_v22 = vadd.f32 %v3203_v51, %v4591_v15 }
 0x810   :  { %v3967_v60 = vadd.f32 %v3134_v16, %v4584_v48  ;;  %v3969_v8 = vadd.f32 %v3205_v2, %v4588_v5 }
 0x811   :  { %v3294_v1 = vmul.f32 -1.442695, %v3966_v29 }
 0x812   :  { %v3295_v28 = vmul.f32 -1.442695, %v3967_v60  ;;  %v3296_v34 = vmul.f32 -1.442695, %v3969_v8 }
 0x813   :  { %4115 = vpow2.f32 %v3294_v1 }
 0x814   :  { %4117 = vpow2.f32 %v3295_v28 }
 0x815   :  { %4119 = vpow2.f32 %v3296_v34 }
 0x816   :  { %4121 = vtanh.f32 %v3968_v22 }
 0x81d   :  { %v4116_v37 = vpop.eup %4115 }
 0x81e   :  { %v4118_v55 = vpop.eup %4117  ;;  %v3215_v26 = vadd.f32 1.0, %v4116_v37 }
 0x81f   :  { %v3221_v31 = vadd.f32 1.0, %v4118_v55  ;;  %v4120_v47 = vpop.eup %4119 }
 0x820   :  { %4123 = vrcp.f32 %v3215_v26  ;;  %v4122_v56 = vpop.eup %4121  ;;  %v3228_v12 = vadd.f32 1.0, %v4120_v47 }
 0x821   :  { %4125 = vrcp.f32 %v3221_v31 }
 0x822   :  { %4127 = vrcp.f32 %v3228_v12 }
 0x82a   :  { %v4124_v48 = vpop.eup %4123 }
 0x82b   :  { %v4126_v36 = vpop.eup %4125  ;;  %v3232_v21 = vmul.f32 %v4124_v48, %v4122_v56 }
 0x82c   :  { %v3231_v7 = vmul.f32 %v4126_v36, %v2834_v11  ;;  %v4128_v5 = vpop.eup %4127 }
 0x82e   :  { %v3233_v18 = vadd.f32 %v3232_v21, %v3231_v7 }
 0x830   :  { %4129 = vtanh.f32 %v3233_v18  ;;  %3239 = vst [vmem:[#allocation3] sm:$0x3] %v3233_v18 }
 0x83a   :  { %v4130_v15 = vpop.eup %4129 }
 0x83b   :  { %v3235_v50 = vmul.f32 %v4130_v15, %v4128_v5 }
 0x83d   :  { %3297 = vst [vmem:[%s5606_s4 + $0xe] sm:$0x3] %v3235_v50  ;;  %3238 = vst [vmem:[#allocation2] sm:$0x3] %v3235_v50 }

</bundles_post_ra>
